<compile_context>
chip_gen: v5e
topology: v5e:2x2
jax: 0.10.0
libtpu: 0.0.40
codegen_flags: <defaults>
</compile_context>

<pallas_src>
import functools

import jax
import jax.numpy as jnp
from jax import lax
from jax.experimental import pallas as pl
from jax.experimental.pallas import tpu as pltpu


# ---------------------------------------------------------------------------
# Fused Pallas kernel: one batch element per grid step.
# ---------------------------------------------------------------------------
def _downsampling_kernel(alpha_ref, taps_ref, row_ref, col_ref,
                         w1_ref, w2_ref, w3_ref, eye_ref,
                         s1_ref, b1_ref, s2_ref, b2_ref, s3_ref, b3_ref,
                         out_ref, idx_ref, h1buf_ref,
                         *, Ho, Wo, W, Cin, Cint, PAD):
    f32 = jnp.float32
    P = Ho * Wo

    ri = row_ref[...]            # (P, 1) int32: output row i
    rj = col_ref[...]            # (P, 1) int32: output col j

    # ---- main branch: 2x2 / stride-2 max pool + PyTorch-style flat argmax ---
    best_v = taps_ref[0]                                         # (P, Cin)
    best_i = jnp.broadcast_to(2 * ri * W + 2 * rj, (P, Cin))
    for t in range(1, 4):
        di, dj = divmod(t, 2)
        v = taps_ref[t]
        take = v > best_v                                        # keep-first ties
        cand = jnp.broadcast_to((2 * ri + di) * W + (2 * rj + dj), (P, Cin))
        best_i = jnp.where(take, cand, best_i)
        best_v = jnp.where(take, v, best_v)
    idx_ref[...] = best_i

    # ---- ext stage 1: 2x2 stride-2 conv (4 accumulated matmuls) + BN + PReLU
    acc1 = jnp.zeros((P, Cint), f32)
    for t in range(4):
        acc1 = acc1 + jnp.dot(taps_ref[t], w1_ref[t],
                              preferred_element_type=f32)
    y1 = acc1 * s1_ref[...] + b1_ref[...]
    h1 = jnp.where(y1 > 0, y1, alpha_ref[0] * y1)                # (P, Cint)

    # ---- ext stage 2: 3x3 pad-1 conv as 9 shifted matmuls over a VMEM buffer
    h1buf_ref[...] = jnp.zeros_like(h1buf_ref)
    h1buf_ref[PAD:PAD + P, :] = h1
    riC = jnp.broadcast_to(ri, (P, Cint))
    rjC = jnp.broadcast_to(rj, (P, Cint))
    acc2 = jnp.zeros((P, Cint), f32)
    for k in range(9):
        dy, dx = k // 3 - 1, k % 3 - 1
        start = PAD + dy * Wo + dx
        win = h1buf_ref[start:start + P, :]                      # (P, Cint)
        conds = []
        if dy > 0:
            conds.append(riC < Ho - dy)
        elif dy < 0:
            conds.append(riC >= -dy)
        if dx > 0:
            conds.append(rjC < Wo - dx)
        elif dx < 0:
            conds.append(rjC >= -dx)
        if conds:
            m = conds[0]
            for c in conds[1:]:
                m = jnp.logical_and(m, c)
            win = jnp.where(m, win, 0.0)
        acc2 = acc2 + jnp.dot(win, w2_ref[k], preferred_element_type=f32)
    y2 = acc2 * s2_ref[...] + b2_ref[...]
    h2 = jnp.where(y2 > 0, y2, alpha_ref[1] * y2)                # (P, Cint)

    # ---- ext stage 3: 1x1 conv + BN + PReLU ---------------------------------
    y3 = jnp.dot(h2, w3_ref[...], preferred_element_type=f32)
    y3 = y3 * s3_ref[...] + b3_ref[...]
    ext = jnp.where(y3 > 0, y3, alpha_ref[2] * y3)               # (P, Cout)

    # ---- residual: zero-extend main branch via identity embedding, out PReLU
    main_wide = jnp.dot(best_v, eye_ref[...], preferred_element_type=f32)
    tot = ext + main_wide
    out_ref[...] = jnp.where(tot > 0, tot, alpha_ref[3] * tot)


# ---------------------------------------------------------------------------
# Forward-pass wrapper (thin XLA glue: one relayout of x, weight reshapes).
# ---------------------------------------------------------------------------
def _fold_bn(gamma, beta, mean, var, eps=1e-5):
    scale = gamma / jnp.sqrt(var + eps)
    bias = beta - mean * scale
    return (scale.reshape(1, -1).astype(jnp.float32),
            bias.reshape(1, -1).astype(jnp.float32))


def downsampling_forward(x, params):
    N, Cin, H, W = x.shape
    assert H % 2 == 0 and W % 2 == 0
    Ho, Wo = H // 2, W // 2
    P = Ho * Wo
    Cint = params["w1"].shape[0]
    Cout = params["w3"].shape[0]
    assert Cout >= Cin
    PAD = ((Wo + 1 + 7) // 8) * 8        # sublane-aligned halo for the 3x3 conv

    # Single relayout of x: NCHW -> (N, tap, P, Cin); tap = di*2+dj of the
    # 2x2/stride-2 window, p = i*Wo + j.  Feeds both the max pool and (as the
    # 4 im2col taps) the 2x2 stride-2 conv.
    taps = (x.reshape(N, Cin, Ho, 2, Wo, 2)
             .transpose(0, 3, 5, 2, 4, 1)
             .reshape(N, 4, P, Cin).astype(jnp.float32))

    pp = jnp.arange(P, dtype=jnp.int32)
    row_idx = (pp // Wo).reshape(P, 1)
    col_idx = (pp % Wo).reshape(P, 1)

    # Per-tap weight matrices laid out for (P, Cin) @ (Cin, Cout) matmuls.
    w1_taps = params["w1"].transpose(2, 3, 1, 0).reshape(4, Cin, Cint)
    w2_taps = params["w2"].transpose(2, 3, 1, 0).reshape(9, Cint, Cint)
    w3_mat = params["w3"].reshape(Cout, Cint).T
    eye = jnp.eye(Cin, Cout, dtype=jnp.float32)   # [I | 0] zero-extension embed

    s1, b1 = _fold_bn(*params["bn1"])
    s2, b2 = _fold_bn(*params["bn2"])
    s3, b3 = _fold_bn(*params["bn3"])
    alphas = jnp.concatenate([params["a1"], params["a2"], params["a3"],
                              params["a_out"]]).astype(jnp.float32)

    kernel = functools.partial(_downsampling_kernel, Ho=Ho, Wo=Wo, W=W,
                               Cin=Cin, Cint=Cint, PAD=PAD)

    out, idx = pl.pallas_call(
        kernel,
        out_shape=(jax.ShapeDtypeStruct((N, P, Cout), jnp.float32),
                   jax.ShapeDtypeStruct((N, P, Cin), jnp.int32)),
        grid=(N,),
        in_specs=[
            pl.BlockSpec(memory_space=pltpu.SMEM),                    # alphas
            pl.BlockSpec((None, 4, P, Cin), lambda n: (n, 0, 0, 0)),  # x taps
            pl.BlockSpec((P, 1), lambda n: (0, 0)),                   # row idx
            pl.BlockSpec((P, 1), lambda n: (0, 0)),                   # col idx
            pl.BlockSpec((4, Cin, Cint), lambda n: (0, 0, 0)),        # w1 taps
            pl.BlockSpec((9, Cint, Cint), lambda n: (0, 0, 0)),       # w2 taps
            pl.BlockSpec((Cint, Cout), lambda n: (0, 0)),             # w3
            pl.BlockSpec((Cin, Cout), lambda n: (0, 0)),              # eye
            pl.BlockSpec((1, Cint), lambda n: (0, 0)),                # s1
            pl.BlockSpec((1, Cint), lambda n: (0, 0)),                # b1
            pl.BlockSpec((1, Cint), lambda n: (0, 0)),                # s2
            pl.BlockSpec((1, Cint), lambda n: (0, 0)),                # b2
            pl.BlockSpec((1, Cout), lambda n: (0, 0)),                # s3
            pl.BlockSpec((1, Cout), lambda n: (0, 0)),                # b3
        ],
        out_specs=(pl.BlockSpec((None, P, Cout), lambda n: (n, 0, 0)),
                   pl.BlockSpec((None, P, Cin), lambda n: (n, 0, 0))),
        scratch_shapes=[pltpu.VMEM((P + 2 * PAD, Cint), jnp.float32)],
        compiler_params=pltpu.CompilerParams(
            dimension_semantics=("parallel",)),
    )(alphas, taps, row_idx, col_idx, w1_taps, w2_taps, w3_mat, eye,
      s1, b1, s2, b2, s3, b3)

    out_nchw = out.reshape(N, Ho, Wo, Cout).transpose(0, 3, 1, 2)
    idx_nchw = idx.reshape(N, Ho, Wo, Cin).transpose(0, 3, 1, 2)
    return out_nchw, idx_nchw


# ---------------------------------------------------------------------------
# Pure-JAX reference (for verification)
# ---------------------------------------------------------------------------
def _prelu(x, a):
    return jnp.where(x > 0, x, a * x)


def _bn_ref(x, gamma, beta, mean, var, eps=1e-5):
    inv = (gamma / jnp.sqrt(var + eps)).reshape(1, -1, 1, 1)
    return (x - mean.reshape(1, -1, 1, 1)) * inv + beta.reshape(1, -1, 1, 1)


def _conv_ref(x, w, stride, pad):
    return lax.conv_general_dilated(
        x, w, window_strides=(stride, stride), padding=pad,
        dimension_numbers=("NCHW", "OIHW", "NCHW"))


def reference_forward(x, params):
    Cout = params["w3"].shape[0]
    h = _prelu(_bn_ref(_conv_ref(x, params["w1"], 2, "VALID"), *params["bn1"]),
               params["a1"][0])
    h = _prelu(_bn_ref(_conv_ref(h, params["w2"], 1, ((1, 1), (1, 1))), *params["bn2"]),
               params["a2"][0])
    ext = _prelu(_bn_ref(_conv_ref(h, params["w3"], 1, "VALID"), *params["bn3"]),
                 params["a3"][0])
    pool = lax.reduce_window(x, -jnp.inf, lax.max, (1, 1, 2, 2), (1, 1, 2, 2), "VALID")
    main = jnp.pad(pool, ((0, 0), (0, Cout - x.shape[1]), (0, 0), (0, 0)))
    return _prelu(main + ext, params["a_out"][0]), pool


# ---------------------------------------------------------------------------
if __name__ == "__main__":
    N, Cin, H, W = 2, 6, 16, 16
    internal_ratio = 3
    Cint = Cin // internal_ratio          # 2
    Cout = 16
    Ho, Wo = H // 2, W // 2

    key = jax.random.PRNGKey(0)
    ks = jax.random.split(key, 8)

    def bn_init(k, c):
        k1, k2, k3, k4 = jax.random.split(k, 4)
        gamma = 1.0 + 0.1 * jax.random.normal(k1, (c,), jnp.float32)
        beta = 0.1 * jax.random.normal(k2, (c,), jnp.float32)
        mean = 0.1 * jax.random.normal(k3, (c,), jnp.float32)
        var = 0.5 + 0.5 * jnp.abs(jax.random.normal(k4, (c,), jnp.float32))
        return (gamma, beta, mean, var)

    params = {
        "w1": 0.3 * jax.random.normal(ks[0], (Cint, Cin, 2, 2), jnp.float32),
        "w2": 0.3 * jax.random.normal(ks[1], (Cint, Cint, 3, 3), jnp.float32),
        "w3": 0.3 * jax.random.normal(ks[2], (Cout, Cint, 1, 1), jnp.float32),
        "bn1": bn_init(ks[3], Cint),
        "bn2": bn_init(ks[4], Cint),
        "bn3": bn_init(ks[5], Cout),
        # nn.PReLU() default single-parameter init = 0.25
        "a1": jnp.full((1,), 0.25, jnp.float32),
        "a2": jnp.full((1,), 0.25, jnp.float32),
        "a3": jnp.full((1,), 0.25, jnp.float32),
        "a_out": jnp.full((1,), 0.25, jnp.float32),
    }

    x = jax.random.normal(ks[6], (N, Cin, H, W), jnp.float32)

    fwd = jax.jit(downsampling_forward)
    out_k, idx_k = fwd(x, params)
    out_k = jax.block_until_ready(out_k)
    idx_k = jax.block_until_ready(idx_k)

    out_r, pool_r = reference_forward(x, params)

    assert out_k.shape == (N, Cout, Ho, Wo) and idx_k.shape == (N, Cin, Ho, Wo)
    assert jnp.allclose(out_k, out_r, atol=5e-4, rtol=5e-4), "output mismatch"

    # verify max-pool indices: gathering x at the returned flat indices must
    # reproduce the pooled values.
    x_flat = x.reshape(N, Cin, H * W)
    gathered = jnp.take_along_axis(
        x_flat, idx_k.reshape(N, Cin, -1), axis=2).reshape(N, Cin, Ho, Wo)
    assert jnp.allclose(gathered, pool_r), "maxpool index mismatch"

    print("KERNEL_OK")
</pallas_src>

<mosaic_0001>
module attributes {stable_mosaic.version = 11 : i64} {
  func.func @_downsampling_kernel(%arg0: i32, %arg1: memref<4xf32, #tpu.memory_space<smem>>, %arg2: memref<1x4x64x6xf32, #tpu.memory_space<vmem>>, %arg3: memref<64x1xi32, #tpu.memory_space<vmem>>, %arg4: memref<64x1xi32, #tpu.memory_space<vmem>>, %arg5: memref<4x6x2xf32, #tpu.memory_space<vmem>>, %arg6: memref<9x2x2xf32, #tpu.memory_space<vmem>>, %arg7: memref<2x16xf32, #tpu.memory_space<vmem>>, %arg8: memref<6x16xf32, #tpu.memory_space<vmem>>, %arg9: memref<1x2xf32, #tpu.memory_space<vmem>>, %arg10: memref<1x2xf32, #tpu.memory_space<vmem>>, %arg11: memref<1x2xf32, #tpu.memory_space<vmem>>, %arg12: memref<1x2xf32, #tpu.memory_space<vmem>>, %arg13: memref<1x16xf32, #tpu.memory_space<vmem>>, %arg14: memref<1x16xf32, #tpu.memory_space<vmem>>, %arg15: memref<1x64x16xf32, #tpu.memory_space<vmem>>, %arg16: memref<1x64x6xi32, #tpu.memory_space<vmem>>, %arg17: memref<96x2xf32, #tpu.memory_space<vmem>>) attributes {dimension_semantics = [#tpu.dimension_semantics<parallel>], iteration_bounds = array<i64: 2>, scalar_prefetch = 0 : i64, scratch_operands = 1 : i64, tpu.core_type = #tpu.core_type<tc>, window_params = [{transform_indices = @transform_0, window_bounds = array<i64: 4>}, {transform_indices = @transform_1, window_bounds = array<i64: 1, 4, 64, 6>}, {pipeline_mode = #tpu.pipeline_mode<synchronous>, transform_indices = @transform_2, window_bounds = array<i64: 64, 1>}, {pipeline_mode = #tpu.pipeline_mode<synchronous>, transform_indices = @transform_3, window_bounds = array<i64: 64, 1>}, {pipeline_mode = #tpu.pipeline_mode<synchronous>, transform_indices = @transform_4, window_bounds = array<i64: 4, 6, 2>}, {pipeline_mode = #tpu.pipeline_mode<synchronous>, transform_indices = @transform_5, window_bounds = array<i64: 9, 2, 2>}, {pipeline_mode = #tpu.pipeline_mode<synchronous>, transform_indices = @transform_6, window_bounds = array<i64: 2, 16>}, {pipeline_mode = #tpu.pipeline_mode<synchronous>, transform_indices = @transform_7, window_bounds = array<i64: 6, 16>}, {pipeline_mode = #tpu.pipeline_mode<synchronous>, transform_indices = @transform_8, window_bounds = array<i64: 1, 2>}, {pipeline_mode = #tpu.pipeline_mode<synchronous>, transform_indices = @transform_9, window_bounds = array<i64: 1, 2>}, {pipeline_mode = #tpu.pipeline_mode<synchronous>, transform_indices = @transform_10, window_bounds = array<i64: 1, 2>}, {pipeline_mode = #tpu.pipeline_mode<synchronous>, transform_indices = @transform_11, window_bounds = array<i64: 1, 2>}, {pipeline_mode = #tpu.pipeline_mode<synchronous>, transform_indices = @transform_12, window_bounds = array<i64: 1, 16>}, {pipeline_mode = #tpu.pipeline_mode<synchronous>, transform_indices = @transform_13, window_bounds = array<i64: 1, 16>}, {transform_indices = @transform_14, window_bounds = array<i64: 1, 64, 16>}, {transform_indices = @transform_15, window_bounds = array<i64: 1, 64, 6>}]} {
    %c0 = arith.constant 0 : index
    %c0_0 = arith.constant 0 : index
    %0 = vector.load %arg3[%c0, %c0_0] : memref<64x1xi32, #tpu.memory_space<vmem>>, vector<64x1xi32>
    %c0_1 = arith.constant 0 : index
    %c0_2 = arith.constant 0 : index
    %1 = vector.load %arg4[%c0_1, %c0_2] : memref<64x1xi32, #tpu.memory_space<vmem>>, vector<64x1xi32>
    %c0_3 = arith.constant 0 : index
    %c0_4 = arith.constant 0 : index
    %c0_5 = arith.constant 0 : index
    %c0_6 = arith.constant 0 : index
    %2 = vector.load %arg2[%c0_3, %c0_4, %c0_5, %c0_6] : memref<1x4x64x6xf32, #tpu.memory_space<vmem>>, vector<1x1x64x6xf32>
    %3 = vector.shape_cast %2 : vector<1x1x64x6xf32> to vector<64x6xf32>
    %c2_i32 = arith.constant 2 : i32
    %4 = vector.broadcast %c2_i32 : i32 to vector<64x1xi32>
    %5 = arith.muli %4, %0 : vector<64x1xi32>
    %c16_i32 = arith.constant 16 : i32
    %6 = vector.broadcast %c16_i32 : i32 to vector<64x1xi32>
    %7 = arith.muli %5, %6 : vector<64x1xi32>
    %c2_i32_7 = arith.constant 2 : i32
    %8 = vector.broadcast %c2_i32_7 : i32 to vector<64x1xi32>
    %9 = arith.muli %8, %1 : vector<64x1xi32>
    %10 = arith.addi %7, %9 : vector<64x1xi32>
    %11 = vector.shape_cast %10 : vector<64x1xi32> to vector<64x1xi32>
    %12 = vector.broadcast %11 : vector<64x1xi32> to vector<64x6xi32>
    %c0_8 = arith.constant 0 : index
    %c1 = arith.constant 1 : index
    %c0_9 = arith.constant 0 : index
    %c0_10 = arith.constant 0 : index
    %13 = vector.load %arg2[%c0_8, %c1, %c0_9, %c0_10] : memref<1x4x64x6xf32, #tpu.memory_space<vmem>>, vector<1x1x64x6xf32>
    %14 = vector.shape_cast %13 : vector<1x1x64x6xf32> to vector<64x6xf32>
    %15 = arith.cmpf ogt, %14, %3 : vector<64x6xf32>
    %c2_i32_11 = arith.constant 2 : i32
    %16 = vector.broadcast %c2_i32_11 : i32 to vector<64x1xi32>
    %17 = arith.muli %16, %0 : vector<64x1xi32>
    %c0_i32 = arith.constant 0 : i32
    %18 = vector.broadcast %c0_i32 : i32 to vector<64x1xi32>
    %19 = arith.addi %17, %18 : vector<64x1xi32>
    %c16_i32_12 = arith.constant 16 : i32
    %20 = vector.broadcast %c16_i32_12 : i32 to vector<64x1xi32>
    %21 = arith.muli %19, %20 : vector<64x1xi32>
    %c2_i32_13 = arith.constant 2 : i32
    %22 = vector.broadcast %c2_i32_13 : i32 to vector<64x1xi32>
    %23 = arith.muli %22, %1 : vector<64x1xi32>
    %c1_i32 = arith.constant 1 : i32
    %24 = vector.broadcast %c1_i32 : i32 to vector<64x1xi32>
    %25 = arith.addi %23, %24 : vector<64x1xi32>
    %26 = arith.addi %21, %25 : vector<64x1xi32>
    %27 = vector.shape_cast %26 : vector<64x1xi32> to vector<64x1xi32>
    %28 = vector.broadcast %27 : vector<64x1xi32> to vector<64x6xi32>
    %29 = arith.select %15, %28, %12 : vector<64x6xi1>, vector<64x6xi32>
    %30 = arith.select %15, %14, %3 : vector<64x6xi1>, vector<64x6xf32>
    %c0_14 = arith.constant 0 : index
    %c2 = arith.constant 2 : index
    %c0_15 = arith.constant 0 : index
    %c0_16 = arith.constant 0 : index
    %31 = vector.load %arg2[%c0_14, %c2, %c0_15, %c0_16] : memref<1x4x64x6xf32, #tpu.memory_space<vmem>>, vector<1x1x64x6xf32>
    %32 = vector.shape_cast %31 : vector<1x1x64x6xf32> to vector<64x6xf32>
    %33 = arith.cmpf ogt, %32, %30 : vector<64x6xf32>
    %c2_i32_17 = arith.constant 2 : i32
    %34 = vector.broadcast %c2_i32_17 : i32 to vector<64x1xi32>
    %35 = arith.muli %34, %0 : vector<64x1xi32>
    %c1_i32_18 = arith.constant 1 : i32
    %36 = vector.broadcast %c1_i32_18 : i32 to vector<64x1xi32>
    %37 = arith.addi %35, %36 : vector<64x1xi32>
    %c16_i32_19 = arith.constant 16 : i32
    %38 = vector.broadcast %c16_i32_19 : i32 to vector<64x1xi32>
    %39 = arith.muli %37, %38 : vector<64x1xi32>
    %c2_i32_20 = arith.constant 2 : i32
    %40 = vector.broadcast %c2_i32_20 : i32 to vector<64x1xi32>
    %41 = arith.muli %40, %1 : vector<64x1xi32>
    %c0_i32_21 = arith.constant 0 : i32
    %42 = vector.broadcast %c0_i32_21 : i32 to vector<64x1xi32>
    %43 = arith.addi %41, %42 : vector<64x1xi32>
    %44 = arith.addi %39, %43 : vector<64x1xi32>
    %45 = vector.shape_cast %44 : vector<64x1xi32> to vector<64x1xi32>
    %46 = vector.broadcast %45 : vector<64x1xi32> to vector<64x6xi32>
    %47 = arith.select %33, %46, %29 : vector<64x6xi1>, vector<64x6xi32>
    %48 = arith.select %33, %32, %30 : vector<64x6xi1>, vector<64x6xf32>
    %c0_22 = arith.constant 0 : index
    %c3 = arith.constant 3 : index
    %c0_23 = arith.constant 0 : index
    %c0_24 = arith.constant 0 : index
    %49 = vector.load %arg2[%c0_22, %c3, %c0_23, %c0_24] : memref<1x4x64x6xf32, #tpu.memory_space<vmem>>, vector<1x1x64x6xf32>
    %50 = vector.shape_cast %49 : vector<1x1x64x6xf32> to vector<64x6xf32>
    %51 = arith.cmpf ogt, %50, %48 : vector<64x6xf32>
    %c2_i32_25 = arith.constant 2 : i32
    %52 = vector.broadcast %c2_i32_25 : i32 to vector<64x1xi32>
    %53 = arith.muli %52, %0 : vector<64x1xi32>
    %c1_i32_26 = arith.constant 1 : i32
    %54 = vector.broadcast %c1_i32_26 : i32 to vector<64x1xi32>
    %55 = arith.addi %53, %54 : vector<64x1xi32>
    %c16_i32_27 = arith.constant 16 : i32
    %56 = vector.broadcast %c16_i32_27 : i32 to vector<64x1xi32>
    %57 = arith.muli %55, %56 : vector<64x1xi32>
    %c2_i32_28 = arith.constant 2 : i32
    %58 = vector.broadcast %c2_i32_28 : i32 to vector<64x1xi32>
    %59 = arith.muli %58, %1 : vector<64x1xi32>
    %c1_i32_29 = arith.constant 1 : i32
    %60 = vector.broadcast %c1_i32_29 : i32 to vector<64x1xi32>
    %61 = arith.addi %59, %60 : vector<64x1xi32>
    %62 = arith.addi %57, %61 : vector<64x1xi32>
    %63 = vector.shape_cast %62 : vector<64x1xi32> to vector<64x1xi32>
    %64 = vector.broadcast %63 : vector<64x1xi32> to vector<64x6xi32>
    %65 = arith.select %51, %64, %47 : vector<64x6xi1>, vector<64x6xi32>
    %66 = arith.select %51, %50, %48 : vector<64x6xi1>, vector<64x6xf32>
    %c0_30 = arith.constant 0 : index
    %c0_31 = arith.constant 0 : index
    %c0_32 = arith.constant 0 : index
    %67 = vector.load %arg16[%c0_30, %c0_31, %c0_32] : memref<1x64x6xi32, #tpu.memory_space<vmem>>, vector<1x64x6xi32>
    %68 = vector.shape_cast %67 : vector<1x64x6xi32> to vector<64x6xi32>
    %69 = vector.shape_cast %65 : vector<64x6xi32> to vector<1x64x6xi32>
    tpu.vector_store %arg16[%c0_30, %c0_31, %c0_32], %69 {strides = array<i32>} : memref<1x64x6xi32, #tpu.memory_space<vmem>>, vector<1x64x6xi32>,
    %cst = arith.constant 0.000000e+00 : f32
    %70 = vector.broadcast %cst : f32 to vector<64x2xf32>
    %c0_33 = arith.constant 0 : index
    %c0_34 = arith.constant 0 : index
    %c0_35 = arith.constant 0 : index
    %c0_36 = arith.constant 0 : index
    %71 = vector.load %arg2[%c0_33, %c0_34, %c0_35, %c0_36] : memref<1x4x64x6xf32, #tpu.memory_space<vmem>>, vector<1x1x64x6xf32>
    %72 = vector.shape_cast %71 : vector<1x1x64x6xf32> to vector<64x6xf32>
    %c0_37 = arith.constant 0 : index
    %c0_38 = arith.constant 0 : index
    %c0_39 = arith.constant 0 : index
    %73 = vector.load %arg5[%c0_37, %c0_38, %c0_39] : memref<4x6x2xf32, #tpu.memory_space<vmem>>, vector<1x6x2xf32>
    %74 = vector.shape_cast %73 : vector<1x6x2xf32> to vector<6x2xf32>
    %cst_40 = arith.constant dense<0.000000e+00> : vector<64x2xf32>
    %75 = tpu.matmul %72, %74, %cst_40 {dimension_numbers = #tpu.dot_dimension_numbers<[1], [0], [0], [1], [0, 0, 1, 1], [], []>} : vector<64x6xf32>, vector<6x2xf32>, vector<64x2xf32> -> vector<64x2xf32>
    %76 = arith.addf %70, %75 : vector<64x2xf32>
    %c0_41 = arith.constant 0 : index
    %c1_42 = arith.constant 1 : index
    %c0_43 = arith.constant 0 : index
    %c0_44 = arith.constant 0 : index
    %77 = vector.load %arg2[%c0_41, %c1_42, %c0_43, %c0_44] : memref<1x4x64x6xf32, #tpu.memory_space<vmem>>, vector<1x1x64x6xf32>
    %78 = vector.shape_cast %77 : vector<1x1x64x6xf32> to vector<64x6xf32>
    %c1_45 = arith.constant 1 : index
    %c0_46 = arith.constant 0 : index
    %c0_47 = arith.constant 0 : index
    %79 = vector.load %arg5[%c1_45, %c0_46, %c0_47] : memref<4x6x2xf32, #tpu.memory_space<vmem>>, vector<1x6x2xf32>
    %80 = vector.shape_cast %79 : vector<1x6x2xf32> to vector<6x2xf32>
    %cst_48 = arith.constant dense<0.000000e+00> : vector<64x2xf32>
    %81 = tpu.matmul %78, %80, %cst_48 {dimension_numbers = #tpu.dot_dimension_numbers<[1], [0], [0], [1], [0, 0, 1, 1], [], []>} : vector<64x6xf32>, vector<6x2xf32>, vector<64x2xf32> -> vector<64x2xf32>
    %82 = arith.addf %76, %81 : vector<64x2xf32>
    %c0_49 = arith.constant 0 : index
    %c2_50 = arith.constant 2 : index
    %c0_51 = arith.constant 0 : index
    %c0_52 = arith.constant 0 : index
    %83 = vector.load %arg2[%c0_49, %c2_50, %c0_51, %c0_52] : memref<1x4x64x6xf32, #tpu.memory_space<vmem>>, vector<1x1x64x6xf32>
    %84 = vector.shape_cast %83 : vector<1x1x64x6xf32> to vector<64x6xf32>
    %c2_53 = arith.constant 2 : index
    %c0_54 = arith.constant 0 : index
    %c0_55 = arith.constant 0 : index
    %85 = vector.load %arg5[%c2_53, %c0_54, %c0_55] : memref<4x6x2xf32, #tpu.memory_space<vmem>>, vector<1x6x2xf32>
    %86 = vector.shape_cast %85 : vector<1x6x2xf32> to vector<6x2xf32>
    %cst_56 = arith.constant dense<0.000000e+00> : vector<64x2xf32>
    %87 = tpu.matmul %84, %86, %cst_56 {dimension_numbers = #tpu.dot_dimension_numbers<[1], [0], [0], [1], [0, 0, 1, 1], [], []>} : vector<64x6xf32>, vector<6x2xf32>, vector<64x2xf32> -> vector<64x2xf32>
    %88 = arith.addf %82, %87 : vector<64x2xf32>
    %c0_57 = arith.constant 0 : index
    %c3_58 = arith.constant 3 : index
    %c0_59 = arith.constant 0 : index
    %c0_60 = arith.constant 0 : index
    %89 = vector.load %arg2[%c0_57, %c3_58, %c0_59, %c0_60] : memref<1x4x64x6xf32, #tpu.memory_space<vmem>>, vector<1x1x64x6xf32>
    %90 = vector.shape_cast %89 : vector<1x1x64x6xf32> to vector<64x6xf32>
    %c3_61 = arith.constant 3 : index
    %c0_62 = arith.constant 0 : index
    %c0_63 = arith.constant 0 : index
    %91 = vector.load %arg5[%c3_61, %c0_62, %c0_63] : memref<4x6x2xf32, #tpu.memory_space<vmem>>, vector<1x6x2xf32>
    %92 = vector.shape_cast %91 : vector<1x6x2xf32> to vector<6x2xf32>
    %cst_64 = arith.constant dense<0.000000e+00> : vector<64x2xf32>
    %93 = tpu.matmul %90, %92, %cst_64 {dimension_numbers = #tpu.dot_dimension_numbers<[1], [0], [0], [1], [0, 0, 1, 1], [], []>} : vector<64x6xf32>, vector<6x2xf32>, vector<64x2xf32> -> vector<64x2xf32>
    %94 = arith.addf %88, %93 : vector<64x2xf32>
    %c0_65 = arith.constant 0 : index
    %c0_66 = arith.constant 0 : index
    %95 = vector.load %arg9[%c0_65, %c0_66] : memref<1x2xf32, #tpu.memory_space<vmem>>, vector<1x2xf32>
    %96 = vector.broadcast %95 : vector<1x2xf32> to vector<64x2xf32>
    %97 = arith.mulf %94, %96 : vector<64x2xf32>
    %c0_67 = arith.constant 0 : index
    %c0_68 = arith.constant 0 : index
    %98 = vector.load %arg10[%c0_67, %c0_68] : memref<1x2xf32, #tpu.memory_space<vmem>>, vector<1x2xf32>
    %99 = vector.broadcast %98 : vector<1x2xf32> to vector<64x2xf32>
    %100 = arith.addf %97, %99 : vector<64x2xf32>
    %cst_69 = arith.constant 0.000000e+00 : f32
    %101 = vector.broadcast %cst_69 : f32 to vector<64x2xf32>
    %102 = arith.cmpf ogt, %100, %101 : vector<64x2xf32>
    %c0_70 = arith.constant 0 : index
    %103 = memref.load %arg1[%c0_70] : memref<4xf32, #tpu.memory_space<smem>>
    %104 = vector.broadcast %103 : f32 to vector<64x2xf32>
    %105 = arith.mulf %104, %100 : vector<64x2xf32>
    %106 = arith.select %102, %100, %105 : vector<64x2xi1>, vector<64x2xf32>
    %cst_71 = arith.constant 0.000000e+00 : f32
    %107 = vector.broadcast %cst_71 : f32 to vector<96x2xf32>
    %c0_72 = arith.constant 0 : index
    %c0_73 = arith.constant 0 : index
    %108 = vector.load %arg17[%c0_72, %c0_73] : memref<96x2xf32, #tpu.memory_space<vmem>>, vector<96x2xf32>
    tpu.vector_store %arg17[%c0_72, %c0_73], %107 {strides = array<i32>} : memref<96x2xf32, #tpu.memory_space<vmem>>, vector<96x2xf32>,
    %c16 = arith.constant 16 : index
    %c0_74 = arith.constant 0 : index
    %109 = vector.load %arg17[%c16, %c0_74] : memref<96x2xf32, #tpu.memory_space<vmem>>, vector<64x2xf32>
    tpu.vector_store %arg17[%c16, %c0_74], %106 {strides = array<i32>} : memref<96x2xf32, #tpu.memory_space<vmem>>, vector<64x2xf32>,
    %110 = vector.shape_cast %0 : vector<64x1xi32> to vector<64x1xi32>
    %111 = vector.broadcast %110 : vector<64x1xi32> to vector<64x2xi32>
    %112 = vector.shape_cast %1 : vector<64x1xi32> to vector<64x1xi32>
    %113 = vector.broadcast %112 : vector<64x1xi32> to vector<64x2xi32>
    %cst_75 = arith.constant 0.000000e+00 : f32
    %114 = vector.broadcast %cst_75 : f32 to vector<64x2xf32>
    %c7 = arith.constant 7 : index
    %c0_76 = arith.constant 0 : index
    %115 = vector.load %arg17[%c7, %c0_76] : memref<96x2xf32, #tpu.memory_space<vmem>>, vector<64x2xf32>
    %c1_i32_77 = arith.constant 1 : i32
    %116 = vector.broadcast %c1_i32_77 : i32 to vector<64x2xi32>
    %117 = arith.cmpi sge, %111, %116 : vector<64x2xi32>
    %c1_i32_78 = arith.constant 1 : i32
    %118 = vector.broadcast %c1_i32_78 : i32 to vector<64x2xi32>
    %119 = arith.cmpi sge, %113, %118 : vector<64x2xi32>
    %120 = arith.andi %117, %119 : vector<64x2xi1>
    %cst_79 = arith.constant 0.000000e+00 : f32
    %121 = vector.broadcast %cst_79 : f32 to vector<64x2xf32>
    %122 = arith.select %120, %115, %121 : vector<64x2xi1>, vector<64x2xf32>
    %c0_80 = arith.constant 0 : index
    %c0_81 = arith.constant 0 : index
    %c0_82 = arith.constant 0 : index
    %123 = vector.load %arg6[%c0_80, %c0_81, %c0_82] : memref<9x2x2xf32, #tpu.memory_space<vmem>>, vector<1x2x2xf32>
    %124 = vector.shape_cast %123 : vector<1x2x2xf32> to vector<2x2xf32>
    %cst_83 = arith.constant dense<0.000000e+00> : vector<64x2xf32>
    %125 = tpu.matmul %122, %124, %cst_83 {dimension_numbers = #tpu.dot_dimension_numbers<[1], [0], [0], [1], [0, 0, 1, 1], [], []>} : vector<64x2xf32>, vector<2x2xf32>, vector<64x2xf32> -> vector<64x2xf32>
    %126 = arith.addf %114, %125 : vector<64x2xf32>
    %c8 = arith.constant 8 : index
    %c0_84 = arith.constant 0 : index
    %127 = vector.load %arg17[%c8, %c0_84] : memref<96x2xf32, #tpu.memory_space<vmem>>, vector<64x2xf32>
    %c1_i32_85 = arith.constant 1 : i32
    %128 = vector.broadcast %c1_i32_85 : i32 to vector<64x2xi32>
    %129 = arith.cmpi sge, %111, %128 : vector<64x2xi32>
    %cst_86 = arith.constant 0.000000e+00 : f32
    %130 = vector.broadcast %cst_86 : f32 to vector<64x2xf32>
    %131 = arith.select %129, %127, %130 : vector<64x2xi1>, vector<64x2xf32>
    %c1_87 = arith.constant 1 : index
    %c0_88 = arith.constant 0 : index
    %c0_89 = arith.constant 0 : index
    %132 = vector.load %arg6[%c1_87, %c0_88, %c0_89] : memref<9x2x2xf32, #tpu.memory_space<vmem>>, vector<1x2x2xf32>
    %133 = vector.shape_cast %132 : vector<1x2x2xf32> to vector<2x2xf32>
    %cst_90 = arith.constant dense<0.000000e+00> : vector<64x2xf32>
    %134 = tpu.matmul %131, %133, %cst_90 {dimension_numbers = #tpu.dot_dimension_numbers<[1], [0], [0], [1], [0, 0, 1, 1], [], []>} : vector<64x2xf32>, vector<2x2xf32>, vector<64x2xf32> -> vector<64x2xf32>
    %135 = arith.addf %126, %134 : vector<64x2xf32>
    %c9 = arith.constant 9 : index
    %c0_91 = arith.constant 0 : index
    %136 = vector.load %arg17[%c9, %c0_91] : memref<96x2xf32, #tpu.memory_space<vmem>>, vector<64x2xf32>
    %c1_i32_92 = arith.constant 1 : i32
    %137 = vector.broadcast %c1_i32_92 : i32 to vector<64x2xi32>
    %138 = arith.cmpi sge, %111, %137 : vector<64x2xi32>
    %c7_i32 = arith.constant 7 : i32
    %139 = vector.broadcast %c7_i32 : i32 to vector<64x2xi32>
    %140 = arith.cmpi slt, %113, %139 : vector<64x2xi32>
    %141 = arith.andi %138, %140 : vector<64x2xi1>
    %cst_93 = arith.constant 0.000000e+00 : f32
    %142 = vector.broadcast %cst_93 : f32 to vector<64x2xf32>
    %143 = arith.select %141, %136, %142 : vector<64x2xi1>, vector<64x2xf32>
    %c2_94 = arith.constant 2 : index
    %c0_95 = arith.constant 0 : index
    %c0_96 = arith.constant 0 : index
    %144 = vector.load %arg6[%c2_94, %c0_95, %c0_96] : memref<9x2x2xf32, #tpu.memory_space<vmem>>, vector<1x2x2xf32>
    %145 = vector.shape_cast %144 : vector<1x2x2xf32> to vector<2x2xf32>
    %cst_97 = arith.constant dense<0.000000e+00> : vector<64x2xf32>
    %146 = tpu.matmul %143, %145, %cst_97 {dimension_numbers = #tpu.dot_dimension_numbers<[1], [0], [0], [1], [0, 0, 1, 1], [], []>} : vector<64x2xf32>, vector<2x2xf32>, vector<64x2xf32> -> vector<64x2xf32>
    %147 = arith.addf %135, %146 : vector<64x2xf32>
    %c15 = arith.constant 15 : index
    %c0_98 = arith.constant 0 : index
    %148 = vector.load %arg17[%c15, %c0_98] : memref<96x2xf32, #tpu.memory_space<vmem>>, vector<64x2xf32>
    %c1_i32_99 = arith.constant 1 : i32
    %149 = vector.broadcast %c1_i32_99 : i32 to vector<64x2xi32>
    %150 = arith.cmpi sge, %113, %149 : vector<64x2xi32>
    %cst_100 = arith.constant 0.000000e+00 : f32
    %151 = vector.broadcast %cst_100 : f32 to vector<64x2xf32>
    %152 = arith.select %150, %148, %151 : vector<64x2xi1>, vector<64x2xf32>
    %c3_101 = arith.constant 3 : index
    %c0_102 = arith.constant 0 : index
    %c0_103 = arith.constant 0 : index
    %153 = vector.load %arg6[%c3_101, %c0_102, %c0_103] : memref<9x2x2xf32, #tpu.memory_space<vmem>>, vector<1x2x2xf32>
    %154 = vector.shape_cast %153 : vector<1x2x2xf32> to vector<2x2xf32>
    %cst_104 = arith.constant dense<0.000000e+00> : vector<64x2xf32>
    %155 = tpu.matmul %152, %154, %cst_104 {dimension_numbers = #tpu.dot_dimension_numbers<[1], [0], [0], [1], [0, 0, 1, 1], [], []>} : vector<64x2xf32>, vector<2x2xf32>, vector<64x2xf32> -> vector<64x2xf32>
    %156 = arith.addf %147, %155 : vector<64x2xf32>
    %c16_105 = arith.constant 16 : index
    %c0_106 = arith.constant 0 : index
    %157 = vector.load %arg17[%c16_105, %c0_106] : memref<96x2xf32, #tpu.memory_space<vmem>>, vector<64x2xf32>
    %c4 = arith.constant 4 : index
    %c0_107 = arith.constant 0 : index
    %c0_108 = arith.constant 0 : index
    %158 = vector.load %arg6[%c4, %c0_107, %c0_108] : memref<9x2x2xf32, #tpu.memory_space<vmem>>, vector<1x2x2xf32>
    %159 = vector.shape_cast %158 : vector<1x2x2xf32> to vector<2x2xf32>
    %cst_109 = arith.constant dense<0.000000e+00> : vector<64x2xf32>
    %160 = tpu.matmul %157, %159, %cst_109 {dimension_numbers = #tpu.dot_dimension_numbers<[1], [0], [0], [1], [0, 0, 1, 1], [], []>} : vector<64x2xf32>, vector<2x2xf32>, vector<64x2xf32> -> vector<64x2xf32>
    %161 = arith.addf %156, %160 : vector<64x2xf32>
    %c17 = arith.constant 17 : index
    %c0_110 = arith.constant 0 : index
    %162 = vector.load %arg17[%c17, %c0_110] : memref<96x2xf32, #tpu.memory_space<vmem>>, vector<64x2xf32>
    %c7_i32_111 = arith.constant 7 : i32
    %163 = vector.broadcast %c7_i32_111 : i32 to vector<64x2xi32>
    %164 = arith.cmpi slt, %113, %163 : vector<64x2xi32>
    %cst_112 = arith.constant 0.000000e+00 : f32
    %165 = vector.broadcast %cst_112 : f32 to vector<64x2xf32>
    %166 = arith.select %164, %162, %165 : vector<64x2xi1>, vector<64x2xf32>
    %c5 = arith.constant 5 : index
    %c0_113 = arith.constant 0 : index
    %c0_114 = arith.constant 0 : index
    %167 = vector.load %arg6[%c5, %c0_113, %c0_114] : memref<9x2x2xf32, #tpu.memory_space<vmem>>, vector<1x2x2xf32>
    %168 = vector.shape_cast %167 : vector<1x2x2xf32> to vector<2x2xf32>
    %cst_115 = arith.constant dense<0.000000e+00> : vector<64x2xf32>
    %169 = tpu.matmul %166, %168, %cst_115 {dimension_numbers = #tpu.dot_dimension_numbers<[1], [0], [0], [1], [0, 0, 1, 1], [], []>} : vector<64x2xf32>, vector<2x2xf32>, vector<64x2xf32> -> vector<64x2xf32>
    %170 = arith.addf %161, %169 : vector<64x2xf32>
    %c23 = arith.constant 23 : index
    %c0_116 = arith.constant 0 : index
    %171 = vector.load %arg17[%c23, %c0_116] : memref<96x2xf32, #tpu.memory_space<vmem>>, vector<64x2xf32>
    %c7_i32_117 = arith.constant 7 : i32
    %172 = vector.broadcast %c7_i32_117 : i32 to vector<64x2xi32>
    %173 = arith.cmpi slt, %111, %172 : vector<64x2xi32>
    %c1_i32_118 = arith.constant 1 : i32
    %174 = vector.broadcast %c1_i32_118 : i32 to vector<64x2xi32>
    %175 = arith.cmpi sge, %113, %174 : vector<64x2xi32>
    %176 = arith.andi %173, %175 : vector<64x2xi1>
    %cst_119 = arith.constant 0.000000e+00 : f32
    %177 = vector.broadcast %cst_119 : f32 to vector<64x2xf32>
    %178 = arith.select %176, %171, %177 : vector<64x2xi1>, vector<64x2xf32>
    %c6 = arith.constant 6 : index
    %c0_120 = arith.constant 0 : index
    %c0_121 = arith.constant 0 : index
    %179 = vector.load %arg6[%c6, %c0_120, %c0_121] : memref<9x2x2xf32, #tpu.memory_space<vmem>>, vector<1x2x2xf32>
    %180 = vector.shape_cast %179 : vector<1x2x2xf32> to vector<2x2xf32>
    %cst_122 = arith.constant dense<0.000000e+00> : vector<64x2xf32>
    %181 = tpu.matmul %178, %180, %cst_122 {dimension_numbers = #tpu.dot_dimension_numbers<[1], [0], [0], [1], [0, 0, 1, 1], [], []>} : vector<64x2xf32>, vector<2x2xf32>, vector<64x2xf32> -> vector<64x2xf32>
    %182 = arith.addf %170, %181 : vector<64x2xf32>
    %c24 = arith.constant 24 : index
    %c0_123 = arith.constant 0 : index
    %183 = vector.load %arg17[%c24, %c0_123] : memref<96x2xf32, #tpu.memory_space<vmem>>, vector<64x2xf32>
    %c7_i32_124 = arith.constant 7 : i32
    %184 = vector.broadcast %c7_i32_124 : i32 to vector<64x2xi32>
    %185 = arith.cmpi slt, %111, %184 : vector<64x2xi32>
    %cst_125 = arith.constant 0.000000e+00 : f32
    %186 = vector.broadcast %cst_125 : f32 to vector<64x2xf32>
    %187 = arith.select %185, %183, %186 : vector<64x2xi1>, vector<64x2xf32>
    %c7_126 = arith.constant 7 : index
    %c0_127 = arith.constant 0 : index
    %c0_128 = arith.constant 0 : index
    %188 = vector.load %arg6[%c7_126, %c0_127, %c0_128] : memref<9x2x2xf32, #tpu.memory_space<vmem>>, vector<1x2x2xf32>
    %189 = vector.shape_cast %188 : vector<1x2x2xf32> to vector<2x2xf32>
    %cst_129 = arith.constant dense<0.000000e+00> : vector<64x2xf32>
    %190 = tpu.matmul %187, %189, %cst_129 {dimension_numbers = #tpu.dot_dimension_numbers<[1], [0], [0], [1], [0, 0, 1, 1], [], []>} : vector<64x2xf32>, vector<2x2xf32>, vector<64x2xf32> -> vector<64x2xf32>
    %191 = arith.addf %182, %190 : vector<64x2xf32>
    %c25 = arith.constant 25 : index
    %c0_130 = arith.constant 0 : index
    %192 = vector.load %arg17[%c25, %c0_130] : memref<96x2xf32, #tpu.memory_space<vmem>>, vector<64x2xf32>
    %c7_i32_131 = arith.constant 7 : i32
    %193 = vector.broadcast %c7_i32_131 : i32 to vector<64x2xi32>
    %194 = arith.cmpi slt, %111, %193 : vector<64x2xi32>
    %c7_i32_132 = arith.constant 7 : i32
    %195 = vector.broadcast %c7_i32_132 : i32 to vector<64x2xi32>
    %196 = arith.cmpi slt, %113, %195 : vector<64x2xi32>
    %197 = arith.andi %194, %196 : vector<64x2xi1>
    %cst_133 = arith.constant 0.000000e+00 : f32
    %198 = vector.broadcast %cst_133 : f32 to vector<64x2xf32>
    %199 = arith.select %197, %192, %198 : vector<64x2xi1>, vector<64x2xf32>
    %c8_134 = arith.constant 8 : index
    %c0_135 = arith.constant 0 : index
    %c0_136 = arith.constant 0 : index
    %200 = vector.load %arg6[%c8_134, %c0_135, %c0_136] : memref<9x2x2xf32, #tpu.memory_space<vmem>>, vector<1x2x2xf32>
    %201 = vector.shape_cast %200 : vector<1x2x2xf32> to vector<2x2xf32>
    %cst_137 = arith.constant dense<0.000000e+00> : vector<64x2xf32>
    %202 = tpu.matmul %199, %201, %cst_137 {dimension_numbers = #tpu.dot_dimension_numbers<[1], [0], [0], [1], [0, 0, 1, 1], [], []>} : vector<64x2xf32>, vector<2x2xf32>, vector<64x2xf32> -> vector<64x2xf32>
    %203 = arith.addf %191, %202 : vector<64x2xf32>
    %c0_138 = arith.constant 0 : index
    %c0_139 = arith.constant 0 : index
    %204 = vector.load %arg11[%c0_138, %c0_139] : memref<1x2xf32, #tpu.memory_space<vmem>>, vector<1x2xf32>
    %205 = vector.broadcast %204 : vector<1x2xf32> to vector<64x2xf32>
    %206 = arith.mulf %203, %205 : vector<64x2xf32>
    %c0_140 = arith.constant 0 : index
    %c0_141 = arith.constant 0 : index
    %207 = vector.load %arg12[%c0_140, %c0_141] : memref<1x2xf32, #tpu.memory_space<vmem>>, vector<1x2xf32>
    %208 = vector.broadcast %207 : vector<1x2xf32> to vector<64x2xf32>
    %209 = arith.addf %206, %208 : vector<64x2xf32>
    %cst_142 = arith.constant 0.000000e+00 : f32
    %210 = vector.broadcast %cst_142 : f32 to vector<64x2xf32>
    %211 = arith.cmpf ogt, %209, %210 : vector<64x2xf32>
    %c1_143 = arith.constant 1 : index
    %212 = memref.load %arg1[%c1_143] : memref<4xf32, #tpu.memory_space<smem>>
    %213 = vector.broadcast %212 : f32 to vector<64x2xf32>
    %214 = arith.mulf %213, %209 : vector<64x2xf32>
    %215 = arith.select %211, %209, %214 : vector<64x2xi1>, vector<64x2xf32>
    %c0_144 = arith.constant 0 : index
    %c0_145 = arith.constant 0 : index
    %216 = vector.load %arg7[%c0_144, %c0_145] : memref<2x16xf32, #tpu.memory_space<vmem>>, vector<2x16xf32>
    %cst_146 = arith.constant dense<0.000000e+00> : vector<64x16xf32>
    %217 = tpu.matmul %215, %216, %cst_146 {dimension_numbers = #tpu.dot_dimension_numbers<[1], [0], [0], [1], [0, 0, 1, 1], [], []>} : vector<64x2xf32>, vector<2x16xf32>, vector<64x16xf32> -> vector<64x16xf32>
    %c0_147 = arith.constant 0 : index
    %c0_148 = arith.constant 0 : index
    %218 = vector.load %arg13[%c0_147, %c0_148] : memref<1x16xf32, #tpu.memory_space<vmem>>, vector<1x16xf32>
    %219 = vector.broadcast %218 : vector<1x16xf32> to vector<64x16xf32>
    %220 = arith.mulf %217, %219 : vector<64x16xf32>
    %c0_149 = arith.constant 0 : index
    %c0_150 = arith.constant 0 : index
    %221 = vector.load %arg14[%c0_149, %c0_150] : memref<1x16xf32, #tpu.memory_space<vmem>>, vector<1x16xf32>
    %222 = vector.broadcast %221 : vector<1x16xf32> to vector<64x16xf32>
    %223 = arith.addf %220, %222 : vector<64x16xf32>
    %cst_151 = arith.constant 0.000000e+00 : f32
    %224 = vector.broadcast %cst_151 : f32 to vector<64x16xf32>
    %225 = arith.cmpf ogt, %223, %224 : vector<64x16xf32>
    %c2_152 = arith.constant 2 : index
    %226 = memref.load %arg1[%c2_152] : memref<4xf32, #tpu.memory_space<smem>>
    %227 = vector.broadcast %226 : f32 to vector<64x16xf32>
    %228 = arith.mulf %227, %223 : vector<64x16xf32>
    %229 = arith.select %225, %223, %228 : vector<64x16xi1>, vector<64x16xf32>
    %c0_153 = arith.constant 0 : index
    %c0_154 = arith.constant 0 : index
    %230 = vector.load %arg8[%c0_153, %c0_154] : memref<6x16xf32, #tpu.memory_space<vmem>>, vector<6x16xf32>
    %cst_155 = arith.constant dense<0.000000e+00> : vector<64x16xf32>
    %231 = tpu.matmul %66, %230, %cst_155 {dimension_numbers = #tpu.dot_dimension_numbers<[1], [0], [0], [1], [0, 0, 1, 1], [], []>} : vector<64x6xf32>, vector<6x16xf32>, vector<64x16xf32> -> vector<64x16xf32>
    %232 = arith.addf %229, %231 : vector<64x16xf32>
    %cst_156 = arith.constant 0.000000e+00 : f32
    %233 = vector.broadcast %cst_156 : f32 to vector<64x16xf32>
    %234 = arith.cmpf ogt, %232, %233 : vector<64x16xf32>
    %c3_157 = arith.constant 3 : index
    %235 = memref.load %arg1[%c3_157] : memref<4xf32, #tpu.memory_space<smem>>
    %236 = vector.broadcast %235 : f32 to vector<64x16xf32>
    %237 = arith.mulf %236, %232 : vector<64x16xf32>
    %238 = arith.select %234, %232, %237 : vector<64x16xi1>, vector<64x16xf32>
    %c0_158 = arith.constant 0 : index
    %c0_159 = arith.constant 0 : index
    %c0_160 = arith.constant 0 : index
    %239 = vector.load %arg15[%c0_158, %c0_159, %c0_160] : memref<1x64x16xf32, #tpu.memory_space<vmem>>, vector<1x64x16xf32>
    %240 = vector.shape_cast %239 : vector<1x64x16xf32> to vector<64x16xf32>
    %241 = vector.shape_cast %238 : vector<64x16xf32> to vector<1x64x16xf32>
    tpu.vector_store %arg15[%c0_158, %c0_159, %c0_160], %241 {strides = array<i32>} : memref<1x64x16xf32, #tpu.memory_space<vmem>>, vector<1x64x16xf32>,
    return
  }
  func.func @transform_0(%arg0: i32) -> i32 {
    %c0_i32 = arith.constant 0 : i32
    %c0_i32_0 = arith.constant 0 : i32
    return %c0_i32 : i32
  }
  func.func @transform_1(%arg0: i32) -> (i32, i32, i32, i32) {
    %c0_i32 = arith.constant 0 : i32
    %c0_i32_0 = arith.constant 0 : i32
    %c0_i32_1 = arith.constant 0 : i32
    %c0_i32_2 = arith.constant 0 : i32
    return %arg0, %c0_i32, %c0_i32_0, %c0_i32_1 : i32, i32, i32, i32
  }
  func.func @transform_2(%arg0: i32) -> (i32, i32) {
    %c0_i32 = arith.constant 0 : i32
    %c0_i32_0 = arith.constant 0 : i32
    %c0_i32_1 = arith.constant 0 : i32
    return %c0_i32, %c0_i32_0 : i32, i32
  }
  func.func @transform_3(%arg0: i32) -> (i32, i32) {
    %c0_i32 = arith.constant 0 : i32
    %c0_i32_0 = arith.constant 0 : i32
    %c0_i32_1 = arith.constant 0 : i32
    return %c0_i32, %c0_i32_0 : i32, i32
  }
  func.func @transform_4(%arg0: i32) -> (i32, i32, i32) {
    %c0_i32 = arith.constant 0 : i32
    %c0_i32_0 = arith.constant 0 : i32
    %c0_i32_1 = arith.constant 0 : i32
    %c0_i32_2 = arith.constant 0 : i32
    return %c0_i32, %c0_i32_0, %c0_i32_1 : i32, i32, i32
  }
  func.func @transform_5(%arg0: i32) -> (i32, i32, i32) {
    %c0_i32 = arith.constant 0 : i32
    %c0_i32_0 = arith.constant 0 : i32
    %c0_i32_1 = arith.constant 0 : i32
    %c0_i32_2 = arith.constant 0 : i32
    return %c0_i32, %c0_i32_0, %c0_i32_1 : i32, i32, i32
  }
  func.func @transform_6(%arg0: i32) -> (i32, i32) {
    %c0_i32 = arith.constant 0 : i32
    %c0_i32_0 = arith.constant 0 : i32
    %c0_i32_1 = arith.constant 0 : i32
    return %c0_i32, %c0_i32_0 : i32, i32
  }
  func.func @transform_7(%arg0: i32) -> (i32, i32) {
    %c0_i32 = arith.constant 0 : i32
    %c0_i32_0 = arith.constant 0 : i32
    %c0_i32_1 = arith.constant 0 : i32
    return %c0_i32, %c0_i32_0 : i32, i32
  }
  func.func @transform_8(%arg0: i32) -> (i32, i32) {
    %c0_i32 = arith.constant 0 : i32
    %c0_i32_0 = arith.constant 0 : i32
    %c0_i32_1 = arith.constant 0 : i32
    return %c0_i32, %c0_i32_0 : i32, i32
  }
  func.func @transform_9(%arg0: i32) -> (i32, i32) {
    %c0_i32 = arith.constant 0 : i32
    %c0_i32_0 = arith.constant 0 : i32
    %c0_i32_1 = arith.constant 0 : i32
    return %c0_i32, %c0_i32_0 : i32, i32
  }
  func.func @transform_10(%arg0: i32) -> (i32, i32) {
    %c0_i32 = arith.constant 0 : i32
    %c0_i32_0 = arith.constant 0 : i32
    %c0_i32_1 = arith.constant 0 : i32
    return %c0_i32, %c0_i32_0 : i32, i32
  }
  func.func @transform_11(%arg0: i32) -> (i32, i32) {
    %c0_i32 = arith.constant 0 : i32
    %c0_i32_0 = arith.constant 0 : i32
    %c0_i32_1 = arith.constant 0 : i32
    return %c0_i32, %c0_i32_0 : i32, i32
  }
  func.func @transform_12(%arg0: i32) -> (i32, i32) {
    %c0_i32 = arith.constant 0 : i32
    %c0_i32_0 = arith.constant 0 : i32
    %c0_i32_1 = arith.constant 0 : i32
    return %c0_i32, %c0_i32_0 : i32, i32
  }
  func.func @transform_13(%arg0: i32) -> (i32, i32) {
    %c0_i32 = arith.constant 0 : i32
    %c0_i32_0 = arith.constant 0 : i32
    %c0_i32_1 = arith.constant 0 : i32
    return %c0_i32, %c0_i32_0 : i32, i32
  }
  func.func @transform_14(%arg0: i32) -> (i32, i32, i32) {
    %c0_i32 = arith.constant 0 : i32
    %c0_i32_0 = arith.constant 0 : i32
    %c0_i32_1 = arith.constant 0 : i32
    return %arg0, %c0_i32, %c0_i32_0 : i32, i32, i32
  }
  func.func @transform_15(%arg0: i32) -> (i32, i32, i32) {
    %c0_i32 = arith.constant 0 : i32
    %c0_i32_0 = arith.constant 0 : i32
    %c0_i32_1 = arith.constant 0 : i32
    return %arg0, %c0_i32, %c0_i32_0 : i32, i32, i32
  }
}

</mosaic_0001>

<bundles_post_ra>
// kernel: downsampling_forward.1
= control target key start
LH: loop header
LB: loop body
LE: loop exit
PB: predicated region body
PF: predicated region fallthrough
CT: control target
= control target key end

     0   :  { %s4713_s0 = inlined_call_operand.vmem [shape: f32[4], index: 0, kind: input, shape index: {}]   ;;  %s4714_s1 = inlined_call_operand.vmem [shape: f32[2,4,64,6], index: 1, kind: input, shape index: {}]   ;;  %s4715_s2 = inlined_call_operand.vmem [shape: s32[64,1], index: 2, kind: input, shape index: {}]   ;;  %s4716_s3 = inlined_call_operand.vmem [shape: s32[64,1], index: 3, kind: input, shape index: {}]   ;;  %s4717_s4 = inlined_call_operand.vmem [shape: f32[4,6,2], index: 4, kind: input, shape index: {}]   ;;  %s4718_s5 = inlined_call_operand.vmem [shape: f32[9,2,2], index: 5, kind: input, shape index: {}]   ;;  %s4719_s6 = inlined_call_operand.vmem [shape: f32[2,16], index: 6, kind: input, shape index: {}]   ;;  %s4720_s7 = inlined_call_operand.vmem [shape: f32[6,16], index: 7, kind: input, shape index: {}]   ;;  %s4721_s8 = inlined_call_operand.vmem [shape: f32[1,2], index: 8, kind: input, shape index: {}]   ;;  %s4722_s9 = inlined_call_operand.vmem [shape: f32[1,2], index: 9, kind: input, shape index: {}]   ;;  %s4723_s10 = inlined_call_operand.vmem [shape: f32[1,2], index: 10, kind: input, shape index: {}]   ;;  %s4724_s11 = inlined_call_operand.vmem [shape: f32[1,2], index: 11, kind: input, shape index: {}]   ;;  %s4725_s12 = inlined_call_operand.vmem [shape: f32[1,16], index: 12, kind: input, shape index: {}]   ;;  %s4726_s13 = inlined_call_operand.vmem [shape: f32[1,16], index: 13, kind: input, shape index: {}]   ;;  %s4727_s14 = inlined_call_operand.hbm [shape: f32[2,64,16], index: 14, kind: output, shape index: {0}]   ;;  %s4728_s15 = inlined_call_operand.vmem [shape: s32[2,64,6], index: 15, kind: output, shape index: {1}]  }
   0x1   :  { %4816 = sst [smem:[#allocation52_spill]] %s4713_s0 }
   0x2   :  { %4817 = sst [smem:[#allocation53_spill]] %s4714_s1 }
   0x3   :  { %21 = vsyncpa [#allocation5], 0 }
   0x4   :  { %22 = vsyncpa [#allocation4], 0 }
   0x5   :  { %24 = vsyncpa [#allocation4 + $0x1], 0  ;;  %s3023_s18 = smov 0   ;;  %s3025_s19 = smov 0  }
   0x6   :  { %s3027_s20 = smov 0   ;;  %s3029_s21 = smov 0  }
   0x7 LB: > { %4818 = sst [smem:[#allocation9_spill]] %s2932_s20  ;;  %s3044_s22 = sadd.s32 4294967295, %s2936_s21   ;;  %s2936_s21 = sphi %s3029_s21, %s5120_s21   ;;  %s2932_s20 = sphi %s3027_s20, %s5122_s20   ;;  %s2928_s19 = sphi %s3025_s19, %s5124_s19   ;;  %s2924_s18 = sphi %s3023_s18, %s5123_s18  }
   0x8   : > { %s2565_s23 = sadd.s32 4294967294, %s2936_s21   ;;  %s3048_s24 = sadd.s32 1, %s2936_s21  }
   0x9   : > { %4819 = sst [smem:[#allocation10_spill]] %s3048_s24  ;;  %s336_s25 = sadd.s32 1, %s2932_s20 }
   0xa   : > { %s333_s26 = ssub.s32 %s2936_s21, %s3048_s24  ;;  %p346_p0 = scmp.ne.s32.totalorder %s2932_s20, %s2928_s19 }
   0xb   : > { %p334_p1 = scmp.eq.s32.totalorder %s333_s26, 0  ;;  %p347_p2 = scmp.eq.s32.totalorder %s3044_s22, 1 }
   0xc   : > { %p352_p3 = scmp.ne.s32.totalorder %s2928_s19, %s2924_s18  ;;  %p353_p4 = scmp.eq.s32.totalorder %s2565_s23, 1 }
   0xd   : > { %s3059_s27 = scalar_select %p334_p1, %s2932_s20, %s336_s25  }
   0xe   : > { %p3061_p5 = por %p347_p2, %p346_p0  ;;  %p3065_p6 = por %p353_p4, %p352_p3 }
   0xf   : > { %4820 = sst [smem:[#allocation11_spill]] %s3059_s27  ;;  %p2566_p7 = scmp.ge.s32.totalorder %s2936_s21, 1 }
  0x10   : > { %s4822_s29 = scalar_select %p3065_p6, 1, 0 }
  0x11   : > { %p386_p8 = scmp.lt.s32.totalorder %s2936_s21, 3  ;;  %p2798_p9 = scmp.eq.s32.totalorder %s3044_s22, 0 }
  0x12   : > { %4823 = sst [smem:[#allocation12_spill]] %s4822_s29  ;;  %s2938_s23 = smov [#allocation3]  }
  0x13   : > { %p387_p10 = pnand %p2566_p7, %p386_p8  ;;  %s4824_s0 = sld [smem:[#allocation52_spill]] }
  0x15   : > { %p2790_p11 = pneg %p387_p10 }
  0x16   : > { %455 = sbr.rel (%p387_p10) target bundleno = 694 (0x2b6), region = 76 }
  0x17   : > { %p2791_p12 = pnand %p2798_p9, %p2790_p11 }
  0x19   : > { %s398_s17 = sshll.u32 %s4824_s0, 4  ;;  %s399_s17 = int_to_ptr.vmem [resolvable:$true] %s398_s17 }
  0x1a   : > { %2793 = dma.vmem_to_smem (!%p2791_p12), %s399_s17, 16, %s2938_s23, [#allocation5]  }
  0x1b   : > { %2915 = dma.done.wait (%p2798_p9), [#allocation5], 16  }
  0x1c   : > { %2917 = vsyncadd (%p2798_p9), [#allocation5], 4294967280 }
  0x1d   : > { %462 = sfence }
  0x1e   : > { %v3078_v0 = vld [vmem:[%s4715_s2 + $0x10] sm:$0xff]  ;;  %v3083_v1 = vld [vmem:[%s4715_s2] sm:$0xff]  ;;  %v2608_v2 = vld [vmem:[%s4717_s4 + $0x8] sm:$0x3f]  ;;  %vm4746_vm0 = vcmask 1045504   ;;  %v2939_v3 = vmov 0  }
  0x1f   : > { %2839 = vset.pattern.permute.xlu1 %v2939_v3  ;;  %2838 = vset.pattern.permute.xlu0 %v2939_v3  ;;  %p510_p13 = scmp.lt.s32.totalorder %s3044_s22, 1  ;;  %v836_v4 = vld [vmem:[%s4717_s4] sm:$0x3f]  ;;  %vm4755_vm1 = vcmask 48128   ;;  %s4825_s1 = sld [smem:[#allocation53_spill]]  ;;  %v3122_v8 = vld [vmem:[%s4715_s2 + $0x18] sm:$0xff] }
  0x20   : > { %1234 = vperm.xlu1 %2839, %v3078_v0   ;;  %1228 = vperm.xlu0 %2838, %v3083_v1   ;;  %v3097_v5 = vld [vmem:[%s4715_s2 + $0x20] sm:$0xff]  ;;  %v2635_v6 = vld [vmem:[%s4717_s4 + $0x10] sm:$0x3f]  ;;  %v3127_v9 = vld [vmem:[%s4715_s2 + $0x8] sm:$0xff]  ;;  %v544_v25 = vmul.u32 2, %v3083_v1  ;;  %v546_v38 = vmul.u32 2, %v3078_v0 }
  0x21   : > { %2781 = vmatpush.msk.msra.mxu3 %vm4746_vm0, %v2608_v2  ;;  %s3101_s25 = scalar_select %p510_p13, %s3044_s22, 1  ;;  %2840 = vset.pattern.permute.xlu2 %v2939_v3  ;;  %v3135_v10 = vld [vmem:[%s4715_s2 + $0x28] sm:$0xff]  ;;  %v528_v12 = vld [vmem:[%s4716_s3] sm:$0xff]  ;;  %v3150_v13 = vld [vmem:[%s4715_s2 + $0x30] sm:$0xff]  ;;  %v545_v28 = vmul.u32 2, %v3127_v9  ;;  %v4737_v39 = vmul.u32 2, %v3122_v8 }
  0x22   : > { %1240 = vperm.xlu2 %2840, %v3097_v5   ;;  %2609 = vmatpush.msk.msra.mxu0 %vm4746_vm0, %v2608_v2  ;;  %v3157_v14 = vld [vmem:[%s4715_s2 + $0x38] sm:$0xff]  ;;  %v530_v18 = vld [vmem:[%s4716_s3 + $0x10] sm:$0xff]  ;;  %v529_v19 = vld [vmem:[%s4716_s3 + $0x8] sm:$0xff]  ;;  %v3225_v32 = vmul.u32 16, %v544_v25  ;;  %v3227_v33 = vmul.u32 2, %v528_v12  ;;  %v4736_v42 = vmul.u32 2, %v3097_v5 }
  0x23   : > { %2782 = vmatpush.msk.msrb.mxu3 %vm4746_vm0, %v836_v4  ;;  %s2778_s26 = sshll.u32 %s3101_s25, 8  ;;  %2618 = vmatpush.msk.msra.mxu1 %vm4746_vm0, %v836_v4  ;;  %v2653_v17 = vld [vmem:[%s4717_s4 + $0x18] sm:$0x3f]  ;;  %v533_v26 = vld [vmem:[%s4716_s3 + $0x28] sm:$0xff]  ;;  %v532_v27 = vld [vmem:[%s4716_s3 + $0x20] sm:$0xff]  ;;  %v3238_v35 = vmul.u32 16, %v545_v28 }
  0x24   : > { %2636 = vmatpush.msk.msra.mxu2 %vm4746_vm0, %v2635_v6  ;;  %v531_v22 = vld [vmem:[%s4716_s3 + $0x18] sm:$0xff]  ;;  %v534_v31 = vld [vmem:[%s4716_s3 + $0x30] sm:$0xff]  ;;  %v3240_v36 = vmul.u32 2, %v529_v19  ;;  %v568_v40 = vadd.s32 %v3227_v33, %v3225_v32  ;;  %v554_v46 = vmul.u32 16, %v546_v38  ;;  %v3269_v47 = vmul.u32 16, %v4737_v39  ;;  %s1188_s20 = sld [smem:[#allocation3]] }
  0x25   : > { %s3111_s17 = scalar_lea.vmem %s4825_s1, %s2778_s26  ;;  %v535_v41 = vld [vmem:[%s4716_s3 + $0x38] sm:$0xff]  ;;  %v3271_v48 = vmul.u32 2, %v530_v18  ;;  %v3273_v49 = vmul.u32 2, %v531_v22  ;;  %v556_v51 = vmul.u32 16, %v4736_v42  ;;  %v3284_v52 = vmul.u32 2, %v532_v27  ;;  %s2779_s24 = sshll.u32 %s3101_s25, 6 }
  0x26   : > { %v3117_v7 = vld [vmem:[%s3111_s17 + $0x70] sm:$0xff]  ;;  %v3142_v11 = vld [vmem:[%s3111_s17 + $0x78] sm:$0xff]  ;;  %v3161_v15 = vld [vmem:[%s3111_s17 + $0x80] sm:$0xff]  ;;  %v569_v43 = vadd.s32 %v3240_v36, %v3238_v35  ;;  %v4734_v54 = vmul.u32 2, %v3150_v13  ;;  %v4735_v55 = vmul.u32 2, %v3135_v10  ;;  %v4733_v58 = vmul.u32 2, %v3157_v14  ;;  %s3735_s16 = scalar_lea.vmem %s4728_s15, %s2779_s24 }
  0x27   : > { %2616 = vmatmul.msk.f32.vlgmr.msra.gmra.mxu3 %vm4755_vm1, %v3117_v7  ;;  %2637 = vmatmul.msk.f32.vlgmr.msra.gmra.mxu2 %vm4755_vm1, %v3161_v15  ;;  %v3167_v16 = vld [vmem:[%s3111_s17 + $0x30] sm:$0xff]  ;;  %v3181_v20 = vld [vmem:[%s3111_s17 + $0x40] sm:$0xff]  ;;  %v3193_v23 = vld [vmem:[%s3111_s17 + $0x88] sm:$0xff]  ;;  %v570_v56 = vadd.s32 %v3271_v48, %v554_v46  ;;  %v571_v57 = vadd.s32 %v3273_v49, %v3269_v47  ;;  %v572_v59 = vadd.s32 %v3284_v52, %v556_v51  ;;  %v3310_v2 = vmul.u32 2, %v533_v26  ;;  %s2752_s27 = sld [smem:[#allocation3 + $0x1]]  ;;  %s2780_s0 = sshll.u32 %s3044_s22, 6 }
  0x28   : > { %2783 = vmatpush.msk.msra.mxu3 %vm4746_vm0, %v2635_v6  ;;  %1237 = vperm.xlu1 %2839, %v3122_v8   ;;  %v3184_v21 = vld [vmem:[%s3111_s17] sm:$0xff]  ;;  %v3200_v24 = vld [vmem:[%s3111_s17 + $0x38] sm:$0xff]  ;;  %v3213_v29 = vld [vmem:[%s3111_s17 + $0x48] sm:$0xff]  ;;  %v558_v62 = vmul.u32 16, %v4734_v54  ;;  %v557_v63 = vmul.u32 16, %v4735_v55  ;;  %v3312_v3 = vmul.u32 2, %v534_v31  ;;  %s2459_s25 = scalar_lea.hbm %s4727_s14, %s2780_s0 }
  0x29   : > { %1231 = vperm.xlu0 %2838, %v3127_v9   ;;  %2610 = vmatmul.msk.f32.vlgmr.msra.gmra.mxu0 %vm4755_vm1, %v3181_v20  ;;  %v3216_v30 = vld [vmem:[%s3111_s17 + $0x8] sm:$0xff]  ;;  %v3230_v34 = vld [vmem:[%s3111_s17 + $0x90] sm:$0xff]  ;;  %v3276_v50 = vld [vmem:[%s3111_s17 + $0x98] sm:$0xff]  ;;  %v559_v6 = vmul.u32 16, %v4733_v58  ;;  %v3376_v58 = vadd.s32 1, %v3273_v49  ;;  %v690_v54 = vadd.s32 1, %v544_v25 }
  0x2a   : > { %1243 = vperm.xlu2 %2840, %v3135_v10   ;;  %2619 = vmatmul.msk.f32.vlgmr.msra.gmra.mxu1 %vm4755_vm1, %v3184_v21  ;;  %v3243_v37 = vld [vmem:[%s3111_s17 + $0xb0] sm:$0xff]  ;;  %v3287_v53 = vld [vmem:[%s3111_s17 + $0xb8] sm:$0xff]  ;;  %v3315_v4 = vld [vmem:[%s3111_s17 + $0xa0] sm:$0xff]  ;;  %v692_v1 = vadd.s32 1, %v546_v38  ;;  %v691_v25 = vadd.s32 1, %v545_v28  ;;  %v4833_v28 = vmul.u32 2, %v3097_v5 }
  0x2b   : > { %4826 = vst [vmem:[#allocation13_spill] sm:$0xff] %v3243_v37  ;;  %v3258_v44 = vld [vmem:[%s3111_s17 + $0x50] sm:$0xff]  ;;  %v3299_v60 = vld [vmem:[%s3111_s17 + $0x58] sm:$0xff]  ;;  %v698_v39 = vmul.u32 16, %v690_v54  ;;  %v3418_v9 = vld [vmem:[%s3111_s17 + $0xe0] sm:$0xff]  ;;  %vm4752_vm2 = vcmask 1041408  }
  0x2c   : > { %v3261_v45 = vld [vmem:[%s3111_s17 + $0x10] sm:$0xff]  ;;  %v3302_v61 = vld [vmem:[%s3111_s17 + $0x18] sm:$0xff]  ;;  %v694_v38 = vadd.s32 1, %v4833_v28  ;;  %vm4789_vm3 = vcmask 15360   ;;  %s2462_s22 = sshll.u32 %s2459_s25, 4  ;;  %s2890_s24 = scalar_lea.hbm %s4727_s14, 128  ;;  %s2463_s22 = int_to_ptr.hbm [resolvable:$true] %s2462_s22 }
  0x2d   : > { %v706_v54 = vadd.s32 %v698_v39, %v3227_v33  ;;  %s2884_s23 = sshra.s32 %s2463_s22, 4  ;;  %s2885_s23 = int_to_ptr.hbm [resolvable:$true] %s2884_s23 }
  0x2e   : > { %p2891_p3 = scmp.lt.s32.totalorder %s2885_s23, %s4727_s14 }
  0x2f   : > { %2617 = vmatmul.msk.f32.gmra.mxu3 %vm4755_vm1, %v3142_v11  ;;  %2638 = vmatmul.msk.f32.gmra.mxu2 %vm4755_vm1, %v3193_v23 }
  0x30   : > { %1252 = vperm.xlu1 %2839, %v528_v12   ;;  %v3323_v12 = vmul.u32 2, %v535_v41 }
  0x31   : > { %1246 = vperm.xlu0 %2838, %v3150_v13   ;;  %2611 = vmatmul.msk.f32.gmra.mxu0 %vm4755_vm1, %v3213_v29 }
  0x32   : > { %1249 = vperm.xlu2 %2840, %v3157_v14   ;;  %2620 = vmatmul.msk.f32.gmra.mxu1 %vm4755_vm1, %v3216_v30  ;;  %v3401_v42 = vadd.s32 1, %v3323_v12 }
  0x37   : > { %2625 = vmatmul.msk.f32.vlgmr.msrb.gmra.mxu3 %vm4755_vm1, %v3167_v16  ;;  %2639 = vmatmul.msk.f32.gmra.mxu2 %vm4755_vm1, %v3230_v34 }
  0x38   : > { %2654 = vmatpush.msk.msrb.mxu3 %vm4746_vm0, %v2653_v17  ;;  %1258 = vperm.xlu1 %2839, %v530_v18   ;;  %v3326_v17 = vld [vmem:[%s3111_s17 + $0xc0] sm:$0xff]  ;;  %v573_v18 = vadd.s32 %v3310_v2, %v557_v63 }
  0x39   : > { %1255 = vperm.xlu0 %2838, %v529_v19   ;;  %2612 = vmatmul.msk.f32.gmra.mxu0 %vm4755_vm1, %v3258_v44  ;;  %v574_v19 = vadd.s32 %v3312_v3, %v558_v62 }
  0x3a   : > { %1261 = vperm.xlu2 %2840, %v531_v22   ;;  %2621 = vmatmul.msk.f32.gmra.mxu1 %vm4755_vm1, %v3261_v45  ;;  %v575_v22 = vadd.s32 %v3323_v12, %v559_v6 }
  0x3f   : > { %2626 = vmatmul.msk.f32.gmra.mxu3 %vm4755_vm1, %v3200_v24  ;;  %2640 = vmatmul.msk.f32.gmra.mxu2 %vm4755_vm1, %v3276_v50 }
  0x40   : > { %1267 = vperm.xlu1 %2839, %v533_v26   ;;  %v3334_v26 = vld [vmem:[%s3111_s17 + $0x60] sm:$0xff] }
  0x41   : > { %1264 = vperm.xlu0 %2838, %v532_v27   ;;  %2613 = vmatmul.msk.f32.gmra.mxu0 %vm4755_vm1, %v3299_v60  ;;  %v3337_v27 = vld [vmem:[%s3111_s17 + $0x20] sm:$0xff] }
  0x42   : > { %1270 = vperm.xlu2 %2840, %v534_v31   ;;  %2622 = vmatmul.msk.f32.gmra.mxu1 %vm4755_vm1, %v3302_v61  ;;  %v3342_v31 = vadd.s32 1, %v3227_v33  ;;  %v4835_v33 = vmul.u32 2, %v3150_v13 }
  0x47   : > { %2643 = vmatmul.msk.f32.vlgmr.msra.gmra.mxu3 %vm4755_vm1, %v3243_v37  ;;  %2641 = vmatmul.msk.f32.gmra.mxu2 %vm4755_vm1, %v3315_v4 }
  0x48   : > { %577 = vperm.xlu1 %2839, %v568_v40   ;;  %v3345_v40 = vadd.s32 1, %v3240_v36 }
  0x49   : > { %1273 = vperm.xlu0 %2838, %v535_v41   ;;  %2614 = vmatmul.msk.f32.gmra.mxu0 %vm4755_vm1, %v3334_v26  ;;  %v3348_v41 = vld [vmem:[%s3111_s17 + $0xa8] sm:$0xff] }
  0x4a   : > { %580 = vperm.xlu2 %2840, %v569_v43   ;;  %4827 = vst [vmem:[#allocation14_spill] sm:$0xff] %v3348_v41  ;;  %2623 = vmatmul.msk.f32.gmra.mxu1 %vm4755_vm1, %v3337_v27  ;;  %v3355_v43 = vadd.s32 1, %v3271_v48 }
  0x4f   : > { %2644 = vmatmul.msk.f32.gmra.mxu3 %vm4755_vm1, %v3287_v53  ;;  %2642 = vmatmul.msk.f32.gmra.mxu2 %vm4755_vm1, %v3348_v41  ;;  %v699_v41 = vmul.u32 16, %v691_v25 }
  0x50   : > { %586 = vperm.xlu1 %2839, %v571_v57   ;;  %v625_v57 = vadd.s32 %v3342_v31, %v3225_v32  ;;  %v3379_v32 = vadd.s32 1, %v3284_v52 }
  0x51   : > { %583 = vperm.xlu0 %2838, %v570_v56   ;;  %v3358_v56 = vld [vmem:[%s3111_s17 + $0xc8] sm:$0xff] }
  0x52   : > { %589 = vperm.xlu2 %2840, %v572_v59   ;;  %v626_v59 = vadd.s32 %v3345_v40, %v3238_v35  ;;  %v3384_v35 = vadd.s32 1, %v3310_v2 }
  0x54   : > { %v630_v55 = vadd.s32 %v3384_v35, %v557_v63  ;;  %v632_v63 = vadd.s32 %v3401_v42, %v559_v6  ;;  %v707_v6 = vadd.s32 %v699_v41, %v3240_v36  ;;  %v4837_v36 = vmul.u32 2, %v3157_v14 }
  0x57   : > { %2655 = vmatmul.msk.f32.vlgmr.msrb.gmra.mxu3 %vm4755_vm1, %v3326_v17 }
  0x58   : > { %595 = vperm.xlu1 %2839, %v574_v19   ;;  %v3368_v19 = vld [vmem:[%s3111_s17 + $0x68] sm:$0xff] }
  0x59   : > { %592 = vperm.xlu0 %2838, %v573_v18   ;;  %v627_v18 = vadd.s32 %v3355_v43, %v554_v46  ;;  %4828 = vst [vmem:[#allocation15_spill] sm:$0xff] %v3368_v19  ;;  %2615 = vmatmul.msk.f32.gmra.mxu0 %vm4755_vm1, %v3368_v19  ;;  %v3387_v46 = vld [vmem:[%s3111_s17 + $0xd0] sm:$0xff] }
  0x5a   : > { %598 = vperm.xlu2 %2840, %v575_v22   ;;  %v3371_v22 = vld [vmem:[%s3111_s17 + $0x28] sm:$0xff]  ;;  %4830 = vst [vmem:[#allocation17_spill] sm:$0xff] %v3387_v46 }
  0x5b   : > { %4829 = vst [vmem:[#allocation16_spill] sm:$0xff] %v3371_v22  ;;  %2624 = vmatmul.msk.f32.gmra.mxu1 %vm4755_vm1, %v3371_v22 }
  0x5f   : > { %2656 = vmatmul.msk.f32.gmra.mxu3 %vm4755_vm1, %v3358_v56 }
  0x60   : > { %637 = vperm.xlu1 %2839, %v626_v59   ;;  %v629_v59 = vadd.s32 %v3379_v32, %v556_v51 }
  0x61   : > { %634 = vperm.xlu0 %2838, %v625_v57   ;;  %v628_v57 = vadd.s32 %v3376_v58, %v3269_v47  ;;  %v3404_v47 = vld [vmem:[%s3111_s17 + $0xd8] sm:$0xff] }
  0x62   : > { %640 = vperm.xlu2 %2840, %v627_v18   ;;  %v3398_v18 = vadd.s32 1, %v3312_v3  ;;  %4831 = vst [vmem:[#allocation18_spill] sm:$0xff] %v3404_v47 }
  0x64   : > { %v631_v51 = vadd.s32 %v3398_v18, %v558_v62 }
  0x67   : > { %2657 = vmatmul.msk.f32.gmra.mxu3 %vm4755_vm1, %v3387_v46  ;;  %v4882_v46 = vmov 0 }
  0x68   : > { %646 = vperm.xlu1 %2839, %v629_v59  }
  0x69   : > { %643 = vperm.xlu0 %2838, %v628_v57   ;;  %v4832_v57 = vmul.u32 2, %v3122_v8  ;;  %v4834_v8 = vmul.u32 2, %v3135_v10  ;;  %v3432_v10 = vld [vmem:[%s3111_s17 + $0xe8] sm:$0xff] }
  0x6a   : > { %649 = vperm.xlu2 %2840, %v630_v55   ;;  %v700_v55 = vmul.u32 16, %v692_v1  ;;  %v696_v1 = vadd.s32 1, %v4835_v33  ;;  %4836 = vst [vmem:[#allocation19_spill] sm:$0xff] %v3432_v10 }
  0x6b   : > { %v693_v59 = vadd.s32 1, %v4832_v57  ;;  %v695_v62 = vadd.s32 1, %v4834_v8 }
  0x6c   : > { %v708_v57 = vadd.s32 %v700_v55, %v3271_v48  ;;  %v704_v5 = vmul.u32 16, %v696_v1  ;;  %v697_v48 = vadd.s32 1, %v4837_v36 }
  0x6d   : > { %v701_v0 = vmul.u32 16, %v693_v59 }
  0x6e   : > { %v705_v28 = vmul.u32 16, %v697_v48 }
  0x6f   : > { %2658 = vmatmul.msk.f32.gmra.mxu3 %vm4755_vm1, %v3404_v47  ;;  %v709_v25 = vadd.s32 %v701_v0, %v3273_v49  ;;  %v712_v49 = vadd.s32 %v704_v5, %v3312_v3  ;;  %v3454_v3 = vld [vmem:[%s3111_s17 + $0xf8] sm:$0xff] }
  0x70   : > { %655 = vperm.xlu1 %2839, %v632_v63   ;;  %v703_v63 = vmul.u32 16, %v695_v62  ;;  %v713_v14 = vadd.s32 %v705_v28, %v3323_v12  ;;  %4840 = vst [vmem:[#allocation22_spill] sm:$0xff] %v3454_v3  ;;  %v773_v62 = vadd.s32 %v700_v55, %v3355_v43 }
  0x71   : > { %652 = vperm.xlu0 %2838, %v631_v51   ;;  %v702_v51 = vmul.u32 16, %v694_v38  ;;  %v3444_v38 = vld [vmem:[%s3111_s17 + $0xf0] sm:$0xff] }
  0x72   : > { %715 = vperm.xlu2 %2840, %v706_v54   ;;  %v711_v59 = vadd.s32 %v703_v63, %v3310_v2  ;;  %4838 = vst [vmem:[#allocation20_spill] sm:$0xff] %v3444_v38  ;;  %v772_v2 = vadd.s32 %v699_v41, %v3345_v40  ;;  %v776_v40 = vadd.s32 %v703_v63, %v3384_v35 }
  0x73   : > { %v710_v13 = vadd.s32 %v702_v51, %v3284_v52  ;;  %v771_v52 = vadd.s32 %v698_v39, %v3342_v31  ;;  %v775_v39 = vadd.s32 %v702_v51, %v3379_v32  ;;  %v777_v41 = vadd.s32 %v704_v5, %v3398_v18 }
  0x74   : > { %v778_v32 = vadd.s32 %v705_v28, %v3401_v42 }
  0x77   : > { %2659 = vmatmul.msk.f32.gmra.mxu3 %vm4755_vm1, %v3418_v9 }
  0x78   : > { %721 = vperm.xlu1 %2839, %v708_v57  }
  0x79   : > { %718 = vperm.xlu0 %2838, %v707_v6   ;;  %v774_v6 = vadd.s32 %v701_v0, %v3376_v58  ;;  %v2663_v58 = vld [vmem:[%s4718_s5 + $0x2] sm:$0x3] }
  0x7a   : > { %724 = vperm.xlu2 %2840, %v709_v25   ;;  %2664 = vmatpush.msk.msrb.mxu0 %vm4752_vm2, %v2663_v58 }
  0x7c   : > { %v3438_v54 = vpop.permute.xlu2 %1240 }
  0x7f   : > { %2660 = vmatmul.msk.f32.gmra.mxu3 %vm4755_vm1, %v3432_v10 }
  0x80   : > { %730 = vperm.xlu1 %2839, %v711_v59  }
  0x81   : > { %727 = vperm.xlu0 %2838, %v710_v13  }
  0x82   : > { %733 = vperm.xlu2 %2840, %v712_v49  }
  0x84   : > { %v3448_v8 = vpop.permute.xlu2 %1243 }
  0x85   : > { %4839 = vst [vmem:[#allocation21_spill] sm:$0xff] %v3448_v8 }
  0x87   : > { %2661 = vmatmul.msk.f32.gmra.mxu3 %vm4755_vm1, %v3444_v38 }
  0x88   : > { %780 = vperm.xlu1 %2839, %v771_v52  }
  0x89   : > { %736 = vperm.xlu0 %2838, %v713_v14   ;;  %v2940_v14 = vmov 0.0  }
  0x8a   : > { %783 = vperm.xlu2 %2840, %v772_v2   ;;  %1209 = vst.msk [vmem:[#allocation2 + $0x10] sm:$0xff] %vm4789_vm3, %v2940_v14 }
  0x8b   : > { %1207 = vst.msk [vmem:[#allocation2] sm:$0xff] %vm4789_vm3, %v2940_v14 }
  0x8c   : > { %v3458_v57 = vpop.permute.xlu2 %1249  ;;  %1208 = vst.msk [vmem:[#allocation2 + $0x8] sm:$0xff] %vm4789_vm3, %v2940_v14 }
  0x8d   : > { %4841 = vst [vmem:[#allocation23_spill] sm:$0xff] %v3458_v57 }
  0x8e   : > { %1210 = vst.msk [vmem:[#allocation2 + $0x18] sm:$0xff] %vm4789_vm3, %v2940_v14 }
  0x8f   : > { %2662 = vmatmul.msk.f32.gmra.mxu3 %vm4755_vm1, %v3454_v3  ;;  %1211 = vst.msk [vmem:[#allocation2 + $0x20] sm:$0xff] %vm4789_vm3, %v2940_v14 }
  0x90   : > { %789 = vperm.xlu1 %2839, %v774_v6   ;;  %1212 = vst.msk [vmem:[#allocation2 + $0x28] sm:$0xff] %vm4789_vm3, %v2940_v14 }
  0x91   : > { %786 = vperm.xlu0 %2838, %v773_v62   ;;  %1213 = vst.msk [vmem:[#allocation2 + $0x30] sm:$0xff] %vm4789_vm3, %v2940_v14 }
  0x92   : > { %v3463_v12 = vpop.permute.xlu1 %1234  ;;  %v3465_v31 = vpop.permute.xlu0 %1228  ;;  %792 = vperm.xlu2 %2840, %v775_v39   ;;  %1214 = vst.msk [vmem:[#allocation2 + $0x38] sm:$0xff] %vm4789_vm3, %v2940_v14 }
  0x93   : > { %vm4758_vm4 = vcmp.ge.s32.totalorder %v3465_v31, 1  ;;  %1215 = vst.msk [vmem:[#allocation2 + $0x40] sm:$0xff] %vm4789_vm3, %v2940_v14  ;;  %v1275_v57 = vld [vmem:[#allocation2 + $0x7] sm:$0xff]  ;;  %vm4756_vm14 = vcmp.ge.s32.totalorder %v3463_v12, 1 }
  0x94   : > { %v3469_v43 = vpop.permute.xlu2 %1261  ;;  %1216 = vst.msk [vmem:[#allocation2 + $0x48] sm:$0xff] %vm4789_vm3, %v2940_v14 }
  0x95   : > { %4842 = vst [vmem:[#allocation24_spill] sm:$0xff] %v3469_v43  ;;  %vm4787_vm0 = vcmp.ge.s32.totalorder %v3469_v43, 1 }
  0x96   : > { %1217 = vst.msk [vmem:[#allocation2 + $0x50] sm:$0xff] %vm4789_vm3, %v2940_v14 }
  0x97   : > { %1218 = vst.msk [vmem:[#allocation2 + $0x58] sm:$0xff] %vm4789_vm3, %v2940_v14 }
  0x98   : > { %798 = vperm.xlu1 %2839, %v777_v41   ;;  %v2692_v41 = vld [vmem:[%s4718_s5 + $0x6] sm:$0x3] }
  0x99   : > { %795 = vperm.xlu0 %2838, %v776_v40   ;;  %v1315_v40 = vld [vmem:[%s4718_s5] sm:$0x3]  ;;  %2693 = vmatpush.msk.msra.mxu3 %vm4752_vm2, %v2692_v41 }
  0x9a   : > { %v3476_v55 = vpop.permute.xlu1 %1237  ;;  %801 = vperm.xlu2 %2840, %v778_v32   ;;  %2673 = vmatpush.msk.msrb.mxu1 %vm4752_vm2, %v1315_v40 }
  0x9b   : > { %v3478_v0 = vpop.permute.xlu0 %1231 }
  0x9c   : > { %v3480_v35 = vpop.permute.xlu2 %1270  ;;  %vm4759_vm6 = vcmp.ge.s32.totalorder %v3478_v0, 1  ;;  %vm4750_vm10 = vcmp.lt.s32.totalorder %v3478_v0, 7 }
  0x9d   : > { %4843 = vst [vmem:[#allocation25_spill] sm:$0xff] %v3480_v35 }
  0xa2   : > { %v3482_v18 = vpop.permute.xlu1 %1252 }
  0xa3   : > { %v3484_v33 = vpop.permute.xlu0 %1246  ;;  %vm4757_vm5 = vcmp.ge.s32.totalorder %v3482_v18, 1 }
  0xa4   : > { %4844 = vst [vmem:[#allocation26_spill] sm:$0xff] %v3484_v33  ;;  %v3486_v1 = vpop.permute.xlu2 %580  ;;  %vm3529_vm8 = vmand %vm4758_vm4, %vm4757_vm5  ;;  %vm4773_vm5 = vcmp.lt.s32.totalorder %v3476_v55, 7 }
  0xa5   : > { %v1307_v35 = vsel %vm3529_vm8, %v1275_v57, 0.0  ;;  %v2682_v57 = vld [vmem:[%s4718_s5 + $0x4] sm:$0x3]  ;;  %vm4762_vm8 = vcmp.ge.s32.totalorder %v3476_v55, 1 }
  0xa6   : > { %v892_v32 = vpop.f32.mrf.mxu0  ;;  %2674 = vmatmul.msk.f32.vlgmr.msrb.gmra.mxu1 %vm4789_vm3, %v1307_v35  ;;  %2683 = vmatpush.msk.msrb.mxu2 %vm4752_vm2, %v2682_v57  ;;  %v4863_v35 = vmov 0  ;;  %v4866_v57 = vmov 0  ;;  %vm3624_vm1 = vmand %vm4762_vm8, %vm4787_vm0 }
  0xaa   : > { %v3488_v25 = vpop.f32.mrf.mxu3  ;;  %v3490_v42 = vpop.permute.xlu1 %1258 }
  0xab   : > { %4845 = vst [vmem:[#allocation27_spill] sm:$0xff] %v3488_v25  ;;  %v3492_v51 = vpop.permute.xlu0 %1255  ;;  %v1038_v33 = vpop.f32.mrf.mxu2  ;;  %vm4771_vm15 = vcmp.ge.s32.totalorder %v3490_v42, 1 }
  0xac   : > { %v3494_v63 = vpop.permute.xlu2 %589  ;;  %vm4751_vm7 = vcmp.lt.s32.totalorder %v3492_v51, 7  ;;  %vm4791_vm11 = vcmp.ge.s32.totalorder %v3492_v51, 1 }
  0xad   : > { %vm3554_vm9 = vmand %vm4759_vm6, %vm4751_vm7  ;;  %vm4783_vm6 = vcmp.lt.s32.totalorder %v3448_v8, 7 }
  0xae   : > { %vm3585_vm12 = vmand %vm4750_vm10, %vm4791_vm11  ;;  %v895_v62 = vpop.f32.mrf.mxu0 }
  0xaf   : > { %v4864_v35 = vsel %vm3585_vm12, 4294967295, %v4863_v35  ;;  %vm3596_vm13 = vmand %vm4750_vm10, %vm4751_vm7  ;;  %vm4766_vm7 = vcmp.ge.s32.totalorder %v3448_v8, 1 }
  0xb0   : > { %4865 = vst [vmem:[#allocation41_spill] sm:$0xff] %v4864_v35  ;;  %v4867_v57 = vsel %vm3596_vm13, 4294967295, %v4866_v57  ;;  %vm3612_vm10 = vmand %vm4756_vm14, %vm4771_vm15  ;;  %vm4769_vm14 = vcmp.lt.s32.totalorder %v3463_v12, 7 }
  0xb1   : > { %4868 = vst [vmem:[#allocation42_spill] sm:$0xff] %v4867_v57  ;;  %vm3648_vm8 = vmand %vm4769_vm14, %vm4771_vm15  ;;  %vm610_vm15 = vcmp.gt.f32.partialorder %v3213_v29, %v3216_v30 }
  0xb2   : > { %v3496_v5 = vpop.f32.mrf.mxu3  ;;  %v3498_v36 = vpop.permute.xlu1 %1267 }
  0xb3   : > { %4846 = vst [vmem:[#allocation28_spill] sm:$0xff] %v3496_v5  ;;  %v3500_v48 = vpop.permute.xlu0 %1264  ;;  %v960_v5 = vpop.f32.mrf.mxu1 }
  0xb4   : > { %4847 = vst [vmem:[#allocation29_spill] sm:$0xff] %v3498_v36  ;;  %v3502_v13 = vpop.permute.xlu2 %598  ;;  %v961_v10 = vadd.f32 %v960_v5, %v892_v32 }
  0xb5   : > { %4848 = vst [vmem:[#allocation30_spill] sm:$0xff] %v3500_v48 }
  0xb6   : > { %v1062_v32 = vadd.f32 %v1038_v33, %v961_v10  ;;  %v898_v37 = vpop.f32.mrf.mxu0  ;;  %v4878_v33 = vmov 0 }
  0xb7   : > { %v4879_v33 = vsel %vm3648_vm8, 4294967295, %v4878_v33 }
  0xb8   : > { %4880 = vst [vmem:[#allocation46_spill] sm:$0xff] %v4879_v33 }
  0xba   : > { %v3504_v59 = vpop.f32.mrf.mxu3  ;;  %v3508_v28 = vpop.permute.xlu1 %577 }
  0xbb   : > { %4849 = vst [vmem:[#allocation31_spill] sm:$0xff] %v3504_v59  ;;  %v3506_v49 = vpop.permute.xlu0 %1273 }
  0xbc   : > { %4850 = vst [vmem:[#allocation32_spill] sm:$0xff] %v3506_v49  ;;  %v3511_v52 = vpop.permute.xlu2 %640  ;;  %v1316_v49 = vld [vmem:[#allocation2 + $0x8] sm:$0xff] }
  0xbd   : > { %4851 = vst [vmem:[#allocation33_spill] sm:$0xff] %v3511_v52  ;;  %v1324_v40 = vsel %vm4758_vm4, %v1316_v49, 0.0  ;;  %v2702_v49 = vld [vmem:[%s4718_s5 + $0x8] sm:$0x3] }
  0xbe   : > { %2665 = vmatmul.msk.f32.vlgmr.msrb.gmra.mxu0 %vm4789_vm3, %v1324_v40  ;;  %v963_v40 = vpop.f32.mrf.mxu1 }
  0xbf   : > { %2703 = vmatpush.msk.msra.mxu0 %vm4752_vm2, %v2702_v49  ;;  %vm4784_vm2 = vcmp.ge.s32.totalorder %v3498_v36, 1  ;;  %v964_v47 = vadd.f32 %v963_v40, %v895_v62  ;;  %v3682_v62 = vstv %s1188_s20  ;;  %s2772_s20 = sld [smem:[#allocation3 + $0x3]] }
  0xc0   : > { %vm3634_vm4 = vmand %vm4766_vm7, %vm4784_vm2 }
  0xc1   : > { %vm3665_vm7 = vmand %vm4773_vm5, %vm4787_vm0 }
  0xc2   : > { %v3522_v2 = vpop.f32.mrf.mxu3  ;;  %v3535_v39 = vpop.permute.xlu1 %586  ;;  %v4883_v46 = vsel %vm3665_vm7, 4294967295, %v4882_v46  ;;  %vm3673_vm14 = vmand %vm4783_vm6, %vm4784_vm2  ;;  %vm4792_vm2 = vcmp.gt.f32.partialorder %v3334_v26, %v3337_v27 }
  0xc3   : > { %4852 = vst [vmem:[#allocation34_spill] sm:$0xff] %v3522_v2  ;;  %v3533_v6 = vpop.permute.xlu0 %583 }
  0xc4   : > { %4855 = vst [vmem:[#allocation35_spill] sm:$0xff] %v3533_v6  ;;  %v3546_v58 = vpop.permute.xlu2 %649 }
  0xc5   : > { %4856 = vst [vmem:[#allocation36_spill] sm:$0xff] %v3535_v39 }
  0xc6   : > { %4857 = vst [vmem:[#allocation37_spill] sm:$0xff] %v3546_v58  ;;  %v966_v10 = vpop.f32.mrf.mxu1 }
  0xc7   : > { %4884 = vst [vmem:[#allocation48_spill] sm:$0xff] %v4883_v46  ;;  %v967_v22 = vadd.f32 %v966_v10, %v898_v37 }
  0xca   : > { %v3568_v41 = vpop.f32.mrf.mxu3  ;;  %v3572_v38 = vpop.permute.xlu1 %595 }
  0xcb   : > { %4860 = vst [vmem:[#allocation38_spill] sm:$0xff] %v3568_v41  ;;  %v3570_v58 = vpop.permute.xlu0 %592 }
  0xcc   : > { %4861 = vst [vmem:[#allocation39_spill] sm:$0xff] %v3570_v58  ;;  %v3589_v14 = vpop.permute.xlu2 %715 }
  0xcd   : > { %4862 = vst [vmem:[#allocation40_spill] sm:$0xff] %v3572_v38  ;;  %v1041_v38 = vpop.f32.mrf.mxu2 }
  0xd2   : > { %v3604_v35 = vpop.f32.mrf.mxu3  ;;  %v638_v58 = vpop.permute.xlu1 %637 }
  0xd3   : > { %4869 = vst [vmem:[#allocation43_spill] sm:$0xff] %v3604_v35  ;;  %v3606_v49 = vpop.permute.xlu0 %634  ;;  %v4875_v35 = vmov 0 }
  0xd4   : > { %v3618_v57 = vpop.permute.xlu2 %724  ;;  %v4876_v35 = vsel %vm3634_vm4, 4294967295, %v4875_v35 }
  0xd5   : > { %4872 = vst [vmem:[#allocation44_spill] sm:$0xff] %v3618_v57  ;;  %v3642_v57 = vld [vmem:[%s4721_s8] ss:$0 sm:$0xff]  ;;  %v1044_v40 = vpop.f32.mrf.mxu2 }
  0xd6   : > { %4877 = vst [vmem:[#allocation45_spill] sm:$0xff] %v4876_v35  ;;  %v3655_v35 = vld [vmem:[%s4722_s9] ss:$0 sm:$0xff] }
  0xda   : > { %v1124_v52 = vpop.f32.mrf.mxu3  ;;  %v3659_v25 = vpop.permute.xlu1 %646 }
  0xdb   : > { %v1148_v6 = vadd.f32 %v1124_v52, %v1062_v32  ;;  %v3657_v59 = vpop.permute.xlu0 %643  ;;  %v4885_v52 = vmov 0 }
  0xdc   : > { %4881 = vst [vmem:[#allocation47_spill] sm:$0xff] %v3657_v59  ;;  %v4886_v52 = vsel %vm3673_vm14, 4294967295, %v4885_v52  ;;  %v3678_v33 = vpop.permute.xlu2 %733  ;;  %v1063_v59 = vadd.f32 %v1041_v38, %v964_v47  ;;  %v901_v47 = vpop.f32.mrf.mxu0 }
  0xdd   : > { %4887 = vst [vmem:[#allocation49_spill] sm:$0xff] %v4886_v52  ;;  %v1160_v32 = vmul.f32 %v3642_v57, %v1148_v6  ;;  %v666_v6 = vsel %vm610_vm15, %v3213_v29, %v3216_v30  ;;  %v969_v38 = vpop.f32.mrf.mxu1  ;;  %v1047_v37 = vpop.f32.mrf.mxu2 }
  0xde   : > { %4888 = vst [vmem:[#allocation50_spill] sm:$0xff] %v3678_v33  ;;  %vm4788_vm6 = vcmp.gt.f32.partialorder %v3193_v23, %v666_v6  ;;  %v970_v48 = vadd.f32 %v969_v38, %v901_v47 }
  0xdf   : > { %v1172_v46 = vadd.f32 %v3655_v35, %v1160_v32 }
  0xe1   : > { %vm1180_vm5 = vcmp.gt.f32.partialorder %v1172_v46, 0.0  ;;  %v1190_v36 = vmul.f32 %v3682_v62, %v1172_v46 }
  0xe2   : > { %v1127_v52 = vpop.f32.mrf.mxu3  ;;  %v3693_v19 = vpop.permute.xlu1 %655 }
  0xe3   : > { %v1198_v8 = vsel %vm1180_vm5, %v1172_v46, %v1190_v36  ;;  %v1149_v33 = vadd.f32 %v1127_v52, %v1063_v59  ;;  %v3691_v39 = vpop.permute.xlu0 %652  ;;  %v1064_v36 = vadd.f32 %v1044_v40, %v967_v22  ;;  %v3704_v59 = vsel %vm4788_vm6, %v3193_v23, %v666_v6 }
  0xe4   : > { %4889 = vst [vmem:[#allocation51_spill] sm:$0xff] %v3691_v39  ;;  %v784_v43 = vpop.permute.xlu2 %783  ;;  %v669_v22 = vsel %vm4792_vm2, %v3334_v26, %v3337_v27  ;;  %vm4895_vm2 = vcmask 15360   ;;  %vm4897_vm6 = vcmp.ge.s32.totalorder %v3478_v0, 1  ;;  %vm4898_vm7 = vcmp.gt.f32.partialorder %v3358_v56, %v3704_v59 }
  0xe5   : > { %1219 = vst.msk [vmem:[#allocation2 + $0x10] sm:$0xff] %vm4789_vm3, %v1198_v8  ;;  %v1161_v32 = vmul.f32 %v3642_v57, %v1149_v33  ;;  %v658_v8 = vsel %vm610_vm15, %v638_v58, %v3486_v1  ;;  %vm4890_vm3 = vcmp.ge.s32.totalorder %v3478_v0, 1  ;;  %vm4896_vm15 = vcmp.gt.f32.partialorder %v3193_v23, %v666_v6 }
  0xe6   : > { %vm3724_vm5 = vmand %vm4890_vm3, %vm4791_vm11  ;;  %vm4893_vm3 = vcmp.lt.s32.totalorder %v3482_v18, 7  ;;  %vm4894_vm11 = vcmp.ge.s32.totalorder %v3465_v31, 1  ;;  %vm686_vm14 = vcmp.gt.f32.partialorder %v3315_v4, %v669_v22 }
  0xe7   : > { %v1173_v46 = vadd.f32 %v3655_v35, %v1161_v32 }
  0xe9   : > { %vm1181_vm0 = vcmp.gt.f32.partialorder %v1173_v46, 0.0  ;;  %v1191_v10 = vmul.f32 %v3682_v62, %v1173_v46 }
  0xea   : > { %v1130_v33 = vpop.f32.mrf.mxu3  ;;  %v3730_v52 = vpop.permute.xlu1 %721 }
  0xeb   : > { %v1199_v30 = vsel %vm1181_vm0, %v1173_v46, %v1191_v10  ;;  %v1150_v1 = vadd.f32 %v1130_v33, %v1064_v36  ;;  %v719_v58 = vpop.permute.xlu0 %718  ;;  %vm1487_vm0 = vmand %vm4894_vm11, %vm4893_vm3  ;;  %v972_v33 = vpop.f32.mrf.mxu1 }
  0xec   : > { %v3737_v40 = vld [vmem:[#allocation2 + $0x10] sm:$0xff]  ;;  %1220 = vst.msk [vmem:[#allocation2 + $0x18] sm:$0xff] %vm4895_vm2, %v1199_v30  ;;  %v739_v46 = vsel %vm4896_vm15, %v719_v58, %v658_v8  ;;  %vm4899_vm11 = vmmov %vm4895_vm2  ;;  %vm4900_vm15 = vcmp.ge.s32.totalorder %v3482_v18, 1  ;;  %v904_v8 = vpop.f32.mrf.mxu0  ;;  %v3773_v30 = vsel %vm686_vm14, %v3315_v4, %v669_v22 }
  0xed   : > { %v1276_v32 = vld [vmem:[#allocation2 + $0xf] sm:$0xff]  ;;  %v1325_v36 = vsel %vm4897_vm6, %v3737_v40, 0.0  ;;  %v1162_v47 = vmul.f32 %v3642_v57, %v1150_v1  ;;  %v804_v38 = vsel %vm4898_vm7, %v784_v43, %v739_v46  ;;  %vm4901_vm6 = vcmask 48128   ;;  %vm4902_vm3 = vmmov %vm4895_vm2  ;;  %v793_v1 = vpop.permute.xlu2 %792 }
  0xee   : > { %v1471_v39 = vld [vmem:[#allocation2 + $0x9] sm:$0xff]  ;;  %v1308_v10 = vsel %vm3724_vm5, %v1276_v32, 0.0  ;;  %2666 = vmatmul.msk.f32.gmra.mxu0 %vm4899_vm11, %v1325_v36  ;;  %v1589_v6 = vsel %vm4900_vm15, %v1276_v32, 0.0  ;;  %821 = vst.msk [vmem:[%s3735_s16 + $0x8] sm:$0xff] %vm4901_vm6, %v804_v38  ;;  %vm4903_vm5 = vmmov %vm4895_vm2  ;;  %vm4904_vm7 = vcmp.gt.f32.partialorder %v3181_v20, %v3184_v21  ;;  %vm4905_vm11 = vcmp.gt.f32.partialorder %v3334_v26, %v3337_v27  ;;  %v1050_v26 = vpop.f32.mrf.mxu2 }
  0xef   : > { %2675 = vmatmul.msk.f32.gmra.mxu1 %vm4895_vm2, %v1308_v10  ;;  %v1495_v23 = vsel %vm1487_vm0, %v1471_v39, 0.0  ;;  %2694 = vmatmul.msk.f32.vlgmr.msra.gmra.mxu3 %vm4903_vm5, %v1589_v6  ;;  %v665_v43 = vsel %vm4904_vm7, %v3181_v20, %v3184_v21  ;;  %v1174_v29 = vadd.f32 %v3655_v35, %v1162_v47  ;;  %v1065_v39 = vadd.f32 %v1047_v37, %v970_v48 }
  0xf0   : > { %2684 = vmatmul.msk.f32.vlgmr.msrb.gmra.mxu2 %vm4902_vm3, %v1495_v23  ;;  %vm616_vm0 = vcmp.gt.f32.partialorder %v3142_v11, %v3200_v24  ;;  %v661_v58 = vsel %vm4905_vm11, %v3659_v25, %v3494_v63  ;;  %vm4794_vm15 = vcmp.gt.f32.partialorder %v3258_v44, %v3261_v45  ;;  %vm682_vm6 = vcmp.gt.f32.partialorder %v3161_v15, %v665_v43 }
  0xf1   : > { %vm1182_vm2 = vcmp.gt.f32.partialorder %v1174_v29, 0.0  ;;  %v1192_v32 = vmul.f32 %v3682_v62, %v1174_v29  ;;  %v3788_v48 = vsel %vm616_vm0, %v3142_v11, %v3200_v24  ;;  %vm4793_vm3 = vcmp.gt.f32.partialorder %v3418_v9, %v3773_v30 }
  0xf2   : > { %v1133_v37 = vpop.f32.mrf.mxu3  ;;  %vm4795_vm5 = vcmp.gt.f32.partialorder %v3299_v60, %v3302_v61  ;;  %v3797_v46 = vpop.permute.xlu1 %730  ;;  %v973_v38 = vadd.f32 %v972_v33, %v904_v8  ;;  %vm4906_vm7 = vcmask 15360   ;;  %vm4907_vm11 = vcmp.ge.s32.totalorder %v3463_v12, 1 }
  0xf3   : > { %v1200_v27 = vsel %vm1182_vm2, %v1174_v29, %v1192_v32  ;;  %v1151_v25 = vadd.f32 %v1133_v37, %v1065_v39  ;;  %v728_v63 = vpop.permute.xlu0 %727  ;;  %v3799_v36 = vld [vmem:[#allocation2 + $0x18] sm:$0xff]  ;;  %vm689_vm2 = vcmp.gt.f32.partialorder %v3287_v53, %v3788_v48  ;;  %v3833_v22 = vsel %vm4795_vm5, %v3299_v60, %v3302_v61 }
  0xf4   : > { %v3801_v10 = vld [vmem:[#allocation2 + $0x17] sm:$0xff]  ;;  %1221 = vst.msk [vmem:[#allocation2 + $0x20] sm:$0xff] %vm4906_vm7, %v1200_v27  ;;  %v742_v23 = vsel %vm686_vm14, %v728_v63, %v661_v58  ;;  %v1326_v6 = vsel %vm4907_vm11, %v3799_v36, 0.0  ;;  %vm4908_vm14 = vmmov %vm4906_vm7  ;;  %v3840_v33 = vsel %vm4794_vm15, %v3258_v44, %v3261_v45  ;;  %vm4910_vm11 = vcmask 48128   ;;  %v907_v27 = vpop.f32.mrf.mxu0 }
  0xf5   : > { %v3803_v47 = vld [vmem:[#allocation2 + $0x11] sm:$0xff]  ;;  %v1309_v29 = vsel %vm3612_vm10, %v3801_v10, 0.0  ;;  %v1163_v39 = vmul.f32 %v3642_v57, %v1151_v25  ;;  %v807_v8 = vsel %vm4793_vm3, %v793_v1, %v742_v23  ;;  %vm4909_vm10 = vcmp.ge.s32.totalorder %v3492_v51, 1  ;;  %v975_v25 = vpop.f32.mrf.mxu1 }
  0xf6   : > { %2667 = vmatmul.msk.f32.gmra.mxu0 %vm4906_vm7, %v1326_v6  ;;  %v1496_v4 = vsel %vm3554_vm9, %v3803_v47, 0.0  ;;  %v1590_v41 = vsel %vm4909_vm10, %v3801_v10, 0.0  ;;  %824 = vst.msk [vmem:[%s3735_s16 + $0x20] sm:$0xff] %vm4910_vm11, %v807_v8  ;;  %vm4911_vm9 = vmmov %vm4906_vm7  ;;  %v3849_v2 = vsel %vm682_vm6, %v3161_v15, %v665_v43  ;;  %v1066_v32 = vadd.f32 %v1050_v26, %v973_v38 }
  0xf7   : > { %2676 = vmatmul.msk.f32.gmra.mxu1 %vm4908_vm14, %v1309_v29  ;;  %2695 = vmatmul.msk.f32.gmra.mxu3 %vm4906_vm7, %v1590_v41  ;;  %vm4912_vm14 = vcmp.gt.f32.partialorder %v3181_v20, %v3184_v21  ;;  %v1175_v58 = vadd.f32 %v3655_v35, %v1163_v39  ;;  %v3862_v37 = vsel %vm689_vm2, %v3287_v53, %v3788_v48  ;;  %vm4799_vm11 = vcmp.lt.s32.totalorder %v3465_v31, 7  ;;  %v1053_v53 = vpop.f32.mrf.mxu2 }
  0xf8   : > { %2685 = vmatmul.msk.f32.gmra.mxu2 %vm4911_vm9, %v1496_v4  ;;  %v657_v1 = vsel %vm4912_vm14, %v3606_v49, %v3508_v28  ;;  %vm4797_vm9 = vcmp.lt.s32.totalorder %v3490_v42, 7  ;;  %vm685_vm7 = vcmp.gt.f32.partialorder %v3276_v50, %v3833_v22  ;;  %vm4796_vm3 = vcmp.gt.f32.partialorder %v3326_v17, %v3849_v2  ;;  %v802_v49 = vpop.permute.xlu2 %801 }
  0xf9   : > { %vm1183_vm14 = vcmp.gt.f32.partialorder %v1175_v58, 0.0  ;;  %v1193_v20 = vmul.f32 %v3682_v62, %v1175_v58  ;;  %v738_v21 = vsel %vm682_vm6, %v3589_v14, %v657_v1  ;;  %vm4800_vm10 = vcmp.gt.f32.partialorder %v3117_v7, %v3167_v16  ;;  %v4923_v1 = vld [vmem:[#allocation30_spill] sm:$0xff] }
  0xfa   : > { %vm684_vm15 = vcmp.gt.f32.partialorder %v3230_v34, %v3840_v33  ;;  %v1136_v28 = vpop.f32.mrf.mxu3  ;;  %vm4798_vm5 = vcmp.gt.f32.partialorder %v3454_v3, %v3862_v37  ;;  %v664_v26 = vsel %vm616_vm0, %v3693_v19, %v3502_v13  ;;  %v781_v43 = vpop.permute.xlu1 %780  ;;  %v976_v29 = vadd.f32 %v975_v25, %v907_v27  ;;  %v2722_v13 = vld [vmem:[%s4718_s5 + $0xc] sm:$0x3]  ;;  %v2732_v27 = vld [vmem:[%s4718_s5 + $0xe] sm:$0x3]  ;;  %v2712_v25 = vld [vmem:[%s4718_s5 + $0xa] sm:$0x3] }
  0xfb   : > { %v1201_v63 = vsel %vm1183_vm14, %v1175_v58, %v1193_v20  ;;  %v1152_v15 = vadd.f32 %v1136_v28, %v1066_v32  ;;  %v737_v14 = vpop.permute.xlu0 %736  ;;  %v3886_v38 = vld [vmem:[#allocation2 + $0x20] sm:$0xff]  ;;  %vm4913_vm6 = vcmask 15360   ;;  %v803_v11 = vsel %vm4796_vm3, %v781_v43, %v738_v21  ;;  %v4932_v43 = vld [vmem:[#allocation47_spill] sm:$0xff] }
  0xfc   : > { %v3888_v23 = vld [vmem:[#allocation2 + $0x1f] sm:$0xff]  ;;  %1222 = vst.msk [vmem:[#allocation2 + $0x28] sm:$0xff] %vm4913_vm6, %v1201_v63  ;;  %v745_v39 = vsel %vm689_vm2, %v737_v14, %v664_v26  ;;  %vm4914_vm0 = vcmp.ge.s32.totalorder %v3476_v55, 1  ;;  %vm4915_vm14 = vcmp.ge.s32.totalorder %v3463_v12, 1  ;;  %vm4916_vm2 = vcmask 48128  }
  0xfd   : > { %v3890_v6 = vld [vmem:[#allocation2 + $0x19] sm:$0xff]  ;;  %v1327_v24 = vsel %vm4914_vm0, %v3886_v38, 0.0  ;;  %v1310_v19 = vsel %vm3624_vm1, %v3888_v23, 0.0  ;;  %vm1489_vm6 = vmand %vm4915_vm14, %vm4797_vm9  ;;  %v1164_v48 = vmul.f32 %v3642_v57, %v1152_v15  ;;  %820 = vst.msk [vmem:[%s3735_s16] sm:$0xff] %vm4916_vm2, %v803_v11  ;;  %v810_v8 = vsel %vm4798_vm5, %v802_v49, %v745_v39  ;;  %v4930_v15 = vld [vmem:[#allocation15_spill] sm:$0xff] }
  0xfe   : > { %vm4917_vm0 = vcmask 15360   ;;  %v1497_v5 = vsel %vm1489_vm6, %v3890_v6, 0.0  ;;  %vm4919_vm14 = vcmp.ge.s32.totalorder %v3490_v42, 1  ;;  %vm4920_vm3 = vcmp.lt.s32.totalorder %v3482_v18, 7  ;;  %v4928_v26 = vld [vmem:[#allocation24_spill] sm:$0xff]  ;;  %v4935_v11 = vld [vmem:[#allocation17_spill] sm:$0xff] }
  0xff   : > { %2668 = vmatmul.msk.f32.gmra.mxu0 %vm4917_vm0, %v1327_v24  ;;  %vm4918_vm1 = vmmov %vm4917_vm0  ;;  %v1591_v4 = vsel %vm4919_vm14, %v3888_v23, 0.0  ;;  %vm4803_vm2 = vcmp.ge.s32.totalorder %v4923_v1, 1  ;;  %vm4924_vm5 = vcmask 48128   ;;  %v3942_v58 = vsel %vm684_vm15, %v3230_v34, %v3840_v33  ;;  %v4929_v63 = vld [vmem:[#allocation16_spill] sm:$0xff]  ;;  %v4936_v24 = vld [vmem:[#allocation18_spill] sm:$0xff] }
 0x100   : > { %2677 = vmatmul.msk.f32.gmra.mxu1 %vm4918_vm1, %v1310_v19  ;;  %vm3928_vm9 = vmand %vm4799_vm11, %vm4920_vm3  ;;  %827 = vst.msk [vmem:[%s3735_s16 + $0x38] sm:$0xff] %vm4924_vm5, %v810_v8  ;;  %2686 = vmatmul.msk.f32.gmra.mxu2 %vm4917_vm0, %v1497_v5  ;;  %v3949_v32 = vsel %vm685_vm7, %v3276_v50, %v3833_v22  ;;  %v671_v20 = vsel %vm4800_vm10, %v3117_v7, %v3167_v16  ;;  %vm4926_vm3 = vcmask 1041408   ;;  %v4931_v14 = vld [vmem:[#allocation36_spill] sm:$0xff]  ;;  %v4937_v19 = vld [vmem:[#allocation27_spill] sm:$0xff] }
 0x101   : > { %vm4925_vm1 = vmmov %vm4917_vm0  ;;  %v1176_v21 = vadd.f32 %v3655_v35, %v1164_v48  ;;  %v1067_v28 = vadd.f32 %v1053_v53, %v976_v29  ;;  %2723 = vmatpush.msk.msra.mxu2 %vm4926_vm3, %v2722_v13  ;;  %vm4804_vm14 = vcmp.gt.f32.partialorder %v4930_v15, %v4929_v63  ;;  %vm4933_vm0 = vcmp.gt.f32.partialorder %v3299_v60, %v3302_v61  ;;  %v4938_v53 = vld [vmem:[#allocation31_spill] sm:$0xff]  ;;  %v4940_v8 = vld [vmem:[#allocation33_spill] sm:$0xff] }
 0x102   : > { %2696 = vmatmul.msk.f32.gmra.mxu3 %vm4925_vm1, %v1591_v4  ;;  %vm4927_vm5 = vmmov %vm4926_vm3  ;;  %v660_v39 = vsel %vm4933_vm0, %v4932_v43, %v4931_v14  ;;  %vm4802_vm11 = vcmp.gt.f32.partialorder %v4936_v24, %v3949_v32  ;;  %v979_v13 = vadd.f32 %v4938_v53, %v4937_v19  ;;  %v4939_v48 = vld [vmem:[#allocation35_spill] sm:$0xff]  ;;  %vm4941_vm10 = vcmp.gt.f32.partialorder %v3258_v44, %v3261_v45  ;;  %v4942_v61 = vld [vmem:[#allocation13_spill] sm:$0xff]  ;;  %v1139_v4 = vpop.f32.mrf.mxu3  ;;  %v790_v53 = vpop.permute.xlu1 %789 }
 0x103   : > { %2733 = vmatpush.msk.msrb.mxu3 %vm4927_vm5, %v2732_v27  ;;  %vm4934_vm1 = vmmov %vm4926_vm3  ;;  %vm1184_vm3 = vcmp.gt.f32.partialorder %v1176_v21, 0.0  ;;  %v1194_v29 = vmul.f32 %v3682_v62, %v1176_v21  ;;  %vm4801_vm5 = vcmp.gt.f32.partialorder %v4935_v11, %v3942_v58  ;;  %v659_v60 = vsel %vm4941_vm10, %v4940_v8, %v4939_v48  ;;  %v787_v19 = vpop.permute.xlu0 %786  ;;  %v4011_v48 = vld [vmem:[#allocation2 + $0x28] sm:$0xff] }
 0x104   : > { %2713 = vmatpush.msk.msra.mxu1 %vm4934_vm1, %v2712_v25  ;;  %vm688_vm0 = vcmp.gt.f32.partialorder %v4942_v61, %v671_v20  ;;  %v670_v5 = vsel %vm4804_vm14, %v4930_v15, %v4929_v63  ;;  %vm4943_vm1 = vcmp.ge.s32.totalorder %v3438_v54, 1  ;;  %v4946_v25 = vld [vmem:[#allocation44_spill] sm:$0xff]  ;;  %v740_v45 = vsel %vm684_vm15, %v3730_v52, %v659_v60  ;;  %v4013_v8 = vld [vmem:[#allocation2 + $0x27] sm:$0xff] }
 0x105   : > { %vm3999_vm6 = vmand %vm4943_vm1, %vm4803_vm2  ;;  %v741_v44 = vsel %vm685_vm7, %v4946_v25, %v660_v39  ;;  %v1202_v14 = vsel %vm1184_vm3, %v1176_v21, %v1194_v29  ;;  %v1153_v43 = vadd.f32 %v1139_v4, %v1067_v28  ;;  %v4015_v49 = vld [vmem:[#allocation2 + $0x21] sm:$0xff]  ;;  %vm4947_vm10 = vcmask 15360   ;;  %v2742_v4 = vld [vmem:[%s4718_s5 + $0x10] sm:$0x3] }
 0x106   : > { %1223 = vst.msk [vmem:[#allocation2 + $0x30] sm:$0xff] %vm4947_vm10, %v1202_v14  ;;  %v805_v50 = vsel %vm4801_vm5, %v787_v19, %v740_v45  ;;  %v806_v34 = vsel %vm4802_vm11, %v790_v53, %v741_v44  ;;  %vm4948_vm15 = vmmov %vm4943_vm1  ;;  %v1311_v22 = vsel %vm3999_vm6, %v4013_v8, 0.0  ;;  %vm4949_vm7 = vcmp.lt.s32.totalorder %v4928_v26, 7  ;;  %v4951_v33 = vld [vmem:[#allocation14_spill] sm:$0xff]  ;;  %v4963_v19 = vld [vmem:[#allocation51_spill] sm:$0xff] }
 0x107   : > { %v1328_v52 = vsel %vm4948_vm15, %v4011_v48, 0.0  ;;  %vm4950_vm3 = vcmp.ge.s32.totalorder %v3476_v55, 1  ;;  %vm687_vm10 = vcmp.gt.f32.partialorder %v4951_v33, %v670_v5  ;;  %v1165_v21 = vmul.f32 %v3642_v57, %v1153_v43  ;;  %v4961_v45 = vld [vmem:[#allocation38_spill] sm:$0xff]  ;;  %v4962_v43 = vld [vmem:[#allocation40_spill] sm:$0xff] }
 0x108   : > { %vm1490_vm1 = vmand %vm4950_vm3, %vm4949_vm7  ;;  %vm4952_vm5 = vcmask 48128   ;;  %vm4953_vm11 = vcmask 15360   ;;  %vm4955_vm6 = vcmp.ge.s32.totalorder %v4928_v26, 1  ;;  %v4051_v29 = vsel %vm687_vm10, %v4951_v33, %v670_v5 }
 0x109   : > { %822 = vst.msk [vmem:[%s3735_s16 + $0x10] sm:$0xff] %vm4952_vm5, %v805_v50  ;;  %2669 = vmatmul.msk.f32.gmra.mxu0 %vm4953_vm11, %v1328_v52  ;;  %vm4954_vm2 = vmmov %vm4953_vm11  ;;  %v1498_v28 = vsel %vm1490_vm1, %v4015_v49, 0.0  ;;  %v1592_v39 = vsel %vm4955_vm6, %v4013_v8, 0.0  ;;  %v4056_v60 = vsel %vm688_vm0, %v4942_v61, %v671_v20  ;;  %v1177_v44 = vadd.f32 %v3655_v35, %v1165_v21  ;;  %v4966_v52 = vld [vmem:[#allocation20_spill] sm:$0xff]  ;;  %v4968_v21 = vld [vmem:[#allocation37_spill] sm:$0xff] }
 0x10a   : > { %2678 = vmatmul.msk.f32.gmra.mxu1 %vm4954_vm2, %v1311_v22  ;;  %vm4956_vm15 = vmmov %vm4952_vm5  ;;  %vm4960_vm11 = vcmask 1041408   ;;  %v1068_v14 = vadd.f32 %v4961_v45, %v979_v13  ;;  %vm4806_vm1 = vcmp.gt.f32.partialorder %v4966_v52, %v4056_v60  ;;  %v4967_v22 = vld [vmem:[#allocation39_spill] sm:$0xff]  ;;  %vm4969_vm6 = vcmp.gt.f32.partialorder %v4930_v15, %v4929_v63  ;;  %v4972_v15 = vld [vmem:[#allocation21_spill] sm:$0xff] }
 0x10b   : > { %823 = vst.msk [vmem:[%s3735_s16 + $0x18] sm:$0xff] %vm4956_vm15, %v806_v34  ;;  %vm4957_vm14 = vmmov %vm4954_vm2  ;;  %2743 = vmatpush.msk.msrb.mxu0 %vm4960_vm11, %v2742_v4  ;;  %vm1185_vm5 = vcmp.gt.f32.partialorder %v1177_v44, 0.0  ;;  %v1195_v50 = vmul.f32 %v3682_v62, %v1177_v44  ;;  %v4965_v34 = vld [vmem:[#allocation19_spill] sm:$0xff]  ;;  %v662_v13 = vsel %vm4969_vm6, %v4968_v21, %v4967_v22  ;;  %vm4976_vm11 = vcmp.lt.s32.totalorder %v3490_v42, 7  ;;  %v4983_v22 = vld [vmem:[#allocation26_spill] sm:$0xff] }
 0x10c   : > { %2687 = vmatmul.msk.f32.gmra.mxu2 %vm4957_vm14, %v1498_v28  ;;  %vm4958_vm7 = vmmov %vm4954_vm2  ;;  %vm4814_vm2 = vcmp.lt.s32.totalorder %v4923_v1, 7  ;;  %vm4964_vm14 = vcmp.gt.f32.partialorder %v3117_v7, %v3167_v16  ;;  %vm4807_vm3 = vcmp.gt.f32.partialorder %v4965_v34, %v4051_v29  ;;  %v1142_v28 = vpop.f32.mrf.mxu3  ;;  %v743_v16 = vsel %vm687_vm10, %v3797_v46, %v662_v13  ;;  %v4984_v21 = vld [vmem:[#allocation25_spill] sm:$0xff] }
 0x10d   : > { %2697 = vmatmul.msk.f32.gmra.mxu3 %vm4958_vm7, %v1592_v39  ;;  %v663_v53 = vsel %vm4964_vm14, %v4963_v19, %v4962_v43  ;;  %v4970_v39 = vld [vmem:[#allocation50_spill] sm:$0xff]  ;;  %v1203_v4 = vsel %vm1185_vm5, %v1177_v44, %v1195_v50  ;;  %v1154_v45 = vadd.f32 %v1142_v28, %v1068_v14  ;;  %v796_v43 = vpop.permute.xlu0 %795  ;;  %v799_v19 = vpop.permute.xlu1 %798  ;;  %v4089_v25 = vld [vmem:[#allocation2 + $0x30] sm:$0xff]  ;;  %vm4971_vm15 = vmmov %vm4958_vm7  ;;  %vm4975_vm10 = vcmp.ge.s32.totalorder %v3438_v54, 1 }
 0x10e   : > { %v744_v7 = vsel %vm688_vm0, %v4970_v39, %v663_v53  ;;  %v4091_v3 = vld [vmem:[#allocation2 + $0x2f] sm:$0xff]  ;;  %1224 = vst.msk [vmem:[#allocation2 + $0x38] sm:$0xff] %vm4971_vm15, %v1203_v4  ;;  %v808_v20 = vsel %vm4807_vm3, %v796_v43, %v743_v16  ;;  %vm4973_vm0 = vcmp.ge.s32.totalorder %v4972_v15, 1  ;;  %vm1491_vm7 = vmand %vm4975_vm10, %vm4814_vm2  ;;  %vm4977_vm14 = vcmp.lt.s32.totalorder %v3463_v12, 7  ;;  %v4988_v28 = vld [vmem:[#allocation29_spill] sm:$0xff] }
 0x10f   : > { %v4093_v63 = vld [vmem:[#allocation2 + $0x29] sm:$0xff]  ;;  %v809_v46 = vsel %vm4806_vm1, %v799_v19, %v744_v7  ;;  %v1329_v61 = vsel %vm4973_vm0, %v4089_v25, 0.0  ;;  %v1312_v33 = vsel %vm3634_vm4, %v4091_v3, 0.0  ;;  %vm4116_vm5 = vmand %vm4977_vm14, %vm4976_vm11  ;;  %v1166_v14 = vmul.f32 %v3642_v57, %v1154_v45  ;;  %v4989_v39 = vld [vmem:[#allocation28_spill] sm:$0xff] }
 0x110   : > { %vm4980_vm6 = vcmask 48128   ;;  %vm4981_vm4 = vmmov %vm4971_vm15  ;;  %v1499_v53 = vsel %vm1491_vm7, %v4093_v63, 0.0  ;;  %vm4982_vm0 = vcmp.ge.s32.totalorder %v4923_v1, 1  ;;  %vm1289_vm10 = vcmp.ge.s32.totalorder %v4983_v22, 1  ;;  %v4990_v7 = vld [vmem:[#allocation34_spill] sm:$0xff]  ;;  %v4991_v45 = vld [vmem:[#allocation43_spill] sm:$0xff] }
 0x111   : > { %825 = vst.msk [vmem:[%s3735_s16 + $0x28] sm:$0xff] %vm4980_vm6, %v808_v20  ;;  %2670 = vmatmul.msk.f32.gmra.mxu0 %vm4971_vm15, %v1329_v61  ;;  %v1593_v50 = vsel %vm4982_vm0, %v4091_v3, 0.0  ;;  %vm4809_vm11 = vcmp.ge.s32.totalorder %v4984_v21, 1  ;;  %vm4985_vm14 = vmmov %vm4980_vm6  ;;  %v2077_v13 = vsel %vm4116_vm5, %v4093_v63, 0.0  ;;  %vm4808_vm7 = vcmp.lt.s32.totalorder %v4988_v28, 7  ;;  %v5004_v20 = vld [vmem:[#allocation32_spill] sm:$0xff] }
 0x112   : > { %2679 = vmatmul.msk.f32.gmra.mxu1 %vm4981_vm4, %v1312_v33  ;;  %826 = vst.msk [vmem:[%s3735_s16 + $0x30] sm:$0xff] %vm4985_vm14, %v809_v46  ;;  %vm4986_vm1 = vmmov %vm4981_vm4  ;;  %v982_v16 = vadd.f32 %v4990_v7, %v4989_v39  ;;  %v1178_v4 = vadd.f32 %v3655_v35, %v1166_v14  ;;  %vm4997_vm0 = vcmp.ge.s32.totalorder %v4988_v28, 1  ;;  %vm4998_vm14 = vcmp.lt.s32.totalorder %v4928_v26, 7 }
 0x113   : > { %vm4987_vm3 = vmmov %vm4986_vm1  ;;  %vm5100_vm5 = vcmp.gt.f32.partialorder %v4936_v24, %v3949_v32 }
 0x114   : > { %2688 = vmatmul.msk.f32.gmra.mxu2 %vm4986_vm1, %v1499_v53  ;;  %v1069_v43 = vadd.f32 %v4991_v45, %v982_v16  ;;  %vm1186_vm6 = vcmp.gt.f32.partialorder %v1178_v4, 0.0  ;;  %v1196_v19 = vmul.f32 %v3682_v62, %v1178_v4  ;;  %v1145_v46 = vpop.f32.mrf.mxu3  ;;  %vm4994_vm1 = vcmp.ge.s32.totalorder %v4972_v15, 1  ;;  %v2330_v45 = vld [vmem:[%s4720_s7] sm:$0x3f] }
 0x115   : > { %2698 = vmatmul.msk.f32.gmra.mxu3 %vm4987_vm3, %v1593_v50  ;;  %vm4148_vm3 = vmand %vm1289_vm10, %vm4809_vm11  ;;  %v4160_v14 = vld [vmem:[#allocation2 + $0x38] sm:$0xff] }
 0x116   : > { %vm4156_vm15 = vmand %vm4994_vm1, %vm4808_vm7  ;;  %v1204_v5 = vsel %vm1186_vm6, %v1178_v4, %v1196_v19  ;;  %v1155_v33 = vadd.f32 %v1145_v46, %v1069_v43  ;;  %v4162_v53 = vld [vmem:[#allocation2 + $0x37] sm:$0xff]  ;;  %v1330_v39 = vsel %vm1289_vm10, %v4160_v14, 0.0  ;;  %vm4999_vm6 = vcmp.lt.s32.totalorder %v3476_v55, 7 }
 0x117   : > { %v4164_v50 = vld [vmem:[#allocation2 + $0x31] sm:$0xff]  ;;  %1225 = vst.msk [vmem:[#allocation2 + $0x40] sm:$0xff] %vm4981_vm4, %v1204_v5  ;;  %v1313_v7 = vsel %vm4148_vm3, %v4162_v53, 0.0  ;;  %v1594_v4 = vsel %vm4997_vm0, %v4162_v53, 0.0  ;;  %vm4183_vm1 = vmand %vm4999_vm6, %vm4998_vm14  ;;  %vm4810_vm7 = vcmp.ge.s32.totalorder %v5004_v20, 1  ;;  %vm4811_vm14 = vcmp.lt.s32.totalorder %v4984_v21, 7 }
 0x118   : > { %v1500_v16 = vsel %vm4156_vm15, %v4164_v50, 0.0  ;;  %v1167_v43 = vmul.f32 %v3642_v57, %v1155_v33  ;;  %vm5002_vm3 = vmmov %vm4981_vm4  ;;  %v5003_v19 = vld [vmem:[#allocation23_spill] sm:$0xff]  ;;  %v2078_v46 = vsel %vm4183_vm1, %v4164_v50, 0.0  ;;  %vm4812_vm6 = vcmp.lt.s32.totalorder %v3438_v54, 7 }
 0x119   : > { %2671 = vmatmul.msk.f32.gmra.mxu0 %vm4981_vm4, %v1330_v39  ;;  %vm1290_vm15 = vcmp.ge.s32.totalorder %v5003_v19, 1  ;;  %vm5005_vm11 = vmmov %vm5002_vm3 }
 0x11a   : > { %2680 = vmatmul.msk.f32.gmra.mxu1 %vm5002_vm3, %v1313_v7  ;;  %vm5006_vm0 = vmmov %vm5002_vm3  ;;  %v1179_v57 = vadd.f32 %v3655_v35, %v1167_v43 }
 0x11b   : > { %vm1493_vm3 = vmand %vm1289_vm10, %vm4811_vm14  ;;  %vm5010_vm10 = vcmp.ge.s32.totalorder %v4984_v21, 1 }
 0x11c   : > { %2689 = vmatmul.msk.f32.gmra.mxu2 %vm5005_vm11, %v1500_v16  ;;  %vm1187_vm4 = vcmp.gt.f32.partialorder %v1179_v57, 0.0  ;;  %v1197_v61 = vmul.f32 %v3682_v62, %v1179_v57  ;;  %vm1306_vm11 = vmand %vm1290_vm15, %vm4810_vm7  ;;  %vm5009_vm7 = vcmask 15360  }
 0x11d   : > { %2699 = vmatmul.msk.f32.gmra.mxu3 %vm5006_vm0, %v1594_v4  ;;  %vm4219_vm0 = vmand %vm4812_vm6, %vm4814_vm2 }
 0x11e   : > { %v1205_v5 = vsel %vm1187_vm4, %v1179_v57, %v1197_v61  ;;  %v4209_v33 = vld [vmem:[#allocation2 + $0x40] sm:$0xff]  ;;  %vm5011_vm4 = vmmov %vm5009_vm7 }
 0x11f   : > { %v4211_v39 = vld [vmem:[#allocation2 + $0x3f] sm:$0xff]  ;;  %1226 = vst.msk [vmem:[#allocation2 + $0x48] sm:$0xff] %vm5009_vm7, %v1205_v5  ;;  %v1331_v7 = vsel %vm1290_vm15, %v4209_v33, 0.0  ;;  %vm5012_vm14 = vmmov %vm5011_vm4 }
 0x120   : > { %v4213_v35 = vld [vmem:[#allocation2 + $0x39] sm:$0xff]  ;;  %v1314_v16 = vsel %vm1306_vm11, %v4211_v39, 0.0  ;;  %v1595_v43 = vsel %vm5010_vm10, %v4211_v39, 0.0  ;;  %vm5013_vm7 = vmmov %vm5011_vm4  ;;  %vm4813_vm11 = vcmp.lt.s32.totalorder %v5004_v20, 7  ;;  %vm5016_vm10 = vcmp.lt.s32.totalorder %v4972_v15, 7 }
 0x121   : > { %v1501_v4 = vsel %vm1493_vm3, %v4213_v35, 0.0  ;;  %2672 = vmatmul.msk.f32.gmra.mxu0 %vm5011_vm4, %v1331_v7  ;;  %vm5014_vm6 = vmmov %vm5011_vm4 }
 0x122   : > { %2681 = vmatmul.msk.f32.gmra.mxu1 %vm5012_vm14, %v1314_v16  ;;  %vm1494_vm3 = vmand %vm1290_vm15, %vm4813_vm11  ;;  %vm5015_vm14 = vcmp.lt.s32.totalorder %v4988_v28, 7  ;;  %vm5021_vm15 = vcmask 15360  }
 0x123   : > { %vm4252_vm4 = vmand %vm5016_vm10, %vm5015_vm14  ;;  %vm5025_vm10 = vcmp.ge.s32.totalorder %v3482_v18, 1  ;;  %v1447_v41 = vpop.f32.mrf.mxu1 }
 0x124   : > { %2690 = vmatmul.msk.f32.gmra.mxu2 %vm5013_vm7, %v1501_v4  ;;  %vm5020_vm7 = vcmp.lt.s32.totalorder %v3482_v18, 7  ;;  %vm5022_vm11 = vmmov %vm5021_vm15 }
 0x125   : > { %2700 = vmatmul.msk.f32.gmra.mxu3 %vm5014_vm6, %v1595_v43  ;;  %vm5019_vm6 = vcmp.ge.s32.totalorder %v5004_v20, 1  ;;  %v1769_v43 = vsel %vm5020_vm7, %v3803_v47, 0.0  ;;  %vm5023_vm14 = vmmov %vm5022_vm11  ;;  %vm5027_vm7 = vcmp.lt.s32.totalorder %v3492_v51, 7  ;;  %v5078_v51 = vsel %vm3596_vm13, %v4015_v49, 0.0 }
 0x126   : > { %v4240_v61 = vld [vmem:[#allocation2 + $0x41] sm:$0xff]  ;;  %v1770_v47 = vsel %vm5027_vm7, %v3890_v6, 0.0 }
 0x127   : > { %v4246_v5 = vld [vmem:[#allocation2 + $0x47] sm:$0xff]  ;;  %v1502_v16 = vsel %vm1494_vm3, %v4240_v61, 0.0  ;;  %v2080_v57 = vsel %vm4252_vm4, %v4240_v61, 0.0  ;;  %vm5024_vm3 = vmmov %vm5022_vm11 }
 0x128   : > { %v1596_v4 = vsel %vm5019_vm6, %v4246_v5, 0.0  ;;  %vm5026_vm6 = vcmp.lt.s32.totalorder %v3465_v31, 7  ;;  %vm5031_vm4 = vmmov %vm5024_vm3 }
 0x129   : > { %2704 = vmatmul.msk.f32.vlgmr.msra.gmra.mxu0 %vm5021_vm15, %v3737_v40  ;;  %vm1871_vm2 = vmand %vm5026_vm6, %vm5025_vm10  ;;  %vm5032_vm10 = vcmp.lt.s32.totalorder %v3490_v42, 7 }
 0x12a   : > { %2714 = vmatmul.msk.f32.vlgmr.msra.gmra.mxu1 %vm5022_vm11, %v1769_v43  ;;  %vm5028_vm15 = vmmov %vm5024_vm3  ;;  %v1879_v40 = vsel %vm1871_vm2, %v3801_v10, 0.0  ;;  %v1771_v18 = vsel %vm5032_vm10, %v4015_v49, 0.0  ;;  %v1880_v10 = vsel %vm3585_vm12, %v3888_v23, 0.0  ;;  %vm5036_vm2 = vcmp.lt.s32.totalorder %v3478_v0, 7  ;;  %v1862_v43 = vld [vmem:[#allocation2 + $0x4f] sm:$0xff] }
 0x12b   : > { %vm5029_vm11 = vmmov %vm5024_vm3  ;;  %v1974_v31 = vsel %vm5036_vm2, %v3886_v38, 0.0  ;;  %v1881_v23 = vsel %vm3648_vm8, %v4013_v8, 0.0  ;;  %vm5042_vm12 = vcmp.lt.s32.totalorder %v3463_v12, 7 }
 0x12c   : > { %2691 = vmatmul.msk.f32.gmra.mxu2 %vm5023_vm14, %v1502_v16  ;;  %vm5030_vm14 = vmmov %vm5026_vm6  ;;  %v1975_v0 = vsel %vm5042_vm12, %v4011_v48, 0.0  ;;  %vm5054_vm12 = vcmp.ge.s32.totalorder %v4923_v1, 1 }
 0x12d   : > { %2701 = vmatmul.msk.f32.gmra.mxu3 %vm5024_vm3, %v1596_v4  ;;  %v1973_v16 = vsel %vm5030_vm14, %v3799_v36, 0.0  ;;  %vm5033_vm6 = vmmov %vm5024_vm3 }
 0x12e   : > { %vm5034_vm7 = vmmov %vm5024_vm3 }
 0x12f   : > { %vm5040_vm14 = vmmov %vm5024_vm3 }
 0x130   : > { %vm5043_vm10 = vmmov %vm5024_vm3 }
 0x131   : > { %2705 = vmatmul.msk.f32.gmra.mxu0 %vm5028_vm15, %v3799_v36  ;;  %vm5037_vm15 = vmmov %vm5024_vm3 }
 0x132   : > { %2715 = vmatmul.msk.f32.gmra.mxu1 %vm5029_vm11, %v1770_v47  ;;  %vm5039_vm11 = vcmp.lt.s32.totalorder %v4928_v26, 7  ;;  %vm5046_vm2 = vmmov %vm5024_vm3  ;;  %v5048_v26 = vld [vmem:[#allocation48_spill] sm:$0xff]  ;;  %v1972_v47 = vld [vmem:[#allocation2 + $0x50] sm:$0xff] }
 0x133   : > { %v1772_v42 = vsel %vm5039_vm11, %v4093_v63, 0.0  ;;  %vm5049_vm8 = vnez %v5048_v26  ;;  %vm5051_vm11 = vmmov %vm5046_vm2  ;;  %v5082_v63 = vsel %vm4219_vm0, %v4213_v35, 0.0  ;;  %vm5086_vm0 = vcmask 1041408  }
 0x134   : > { %2724 = vmatmul.msk.f32.vlgmr.msra.gmra.mxu2 %vm5024_vm3, %v1879_v40  ;;  %v1882_v8 = vsel %vm5049_vm8, %v4091_v3, 0.0  ;;  %vm5058_vm8 = vmmov %vm5046_vm2 }
 0x135   : > { %2734 = vmatmul.msk.f32.vlgmr.msrb.gmra.mxu3 %vm5031_vm4, %v1973_v16  ;;  %vm5038_vm4 = vmmov %vm5024_vm3  ;;  %v5074_v16 = vsel %vm3928_vm9, %v3890_v6, 0.0 }
 0x139   : > { %2706 = vmatmul.msk.f32.gmra.mxu0 %vm5033_vm6, %v3886_v38  ;;  %vm5044_vm6 = vmmov %vm5024_vm3 }
 0x13a   : > { %2716 = vmatmul.msk.f32.gmra.mxu1 %vm5034_vm7, %v1771_v18  ;;  %vm5045_vm7 = vcmp.lt.s32.totalorder %v4923_v1, 7 }
 0x13b   : > { %v1773_v38 = vsel %vm5045_vm7, %v4164_v50, 0.0  ;;  %vm5056_vm7 = vmmov %vm5046_vm2  ;;  %v2211_v50 = vld [vmem:[%s4719_s6] sm:$0x3] }
 0x13c   : > { %2725 = vmatmul.msk.f32.gmra.mxu2 %vm5037_vm15, %v1880_v10  ;;  %vm5047_vm15 = vmmov %vm5046_vm2  ;;  %2753 = vmatpush.msk.msrb.mxu1 %vm5086_vm0, %v2211_v50 }
 0x13d   : > { %2735 = vmatmul.msk.f32.gmra.mxu3 %vm5038_vm4, %v1974_v31  ;;  %vm5050_vm4 = vcmp.lt.s32.totalorder %v3476_v55, 7 }
 0x13e   : > { %v1976_v12 = vsel %vm5050_vm4, %v4089_v25, 0.0  ;;  %vm5059_vm4 = vmmov %vm5046_vm2 }
 0x141   : > { %2707 = vmatmul.msk.f32.gmra.mxu0 %vm5040_vm14, %v4011_v48  ;;  %vm5052_vm14 = vmmov %vm5046_vm2 }
 0x142   : > { %2717 = vmatmul.msk.f32.gmra.mxu1 %vm5024_vm3, %v1772_v42  ;;  %vm5053_vm3 = vcmp.lt.s32.totalorder %v4988_v28, 7 }
 0x143   : > { %v1774_v48 = vsel %vm5053_vm3, %v4213_v35, 0.0  ;;  %vm5062_vm3 = vmmov %vm5046_vm2 }
 0x144   : > { %2726 = vmatmul.msk.f32.gmra.mxu2 %vm5043_vm10, %v1881_v23  ;;  %vm5055_vm10 = vcmp.lt.s32.totalorder %v3438_v54, 7  ;;  %vm5080_vm9 = vmmov %vm5062_vm3  ;;  %v2066_v23 = vld [vmem:[#allocation2 + $0x51] sm:$0xff] }
 0x145   : > { %2736 = vmatmul.msk.f32.gmra.mxu3 %vm5044_vm6, %v1975_v0  ;;  %vm1875_vm6 = vmand %vm5055_vm10, %vm5054_vm12 }
 0x146   : > { %v1883_v3 = vsel %vm1875_vm6, %v4162_v53, 0.0  ;;  %vm5066_vm6 = vmmov %vm5046_vm2  ;;  %v1682_v53 = vld [vmem:[#allocation2 + $0x48] sm:$0xff] }
 0x147   : > { %vm5083_vm13 = vmmov %vm5062_vm3 }
 0x148   : > { %vm5085_vm1 = vmmov %vm5062_vm3 }
 0x149   : > { %2708 = vmatmul.msk.f32.gmra.mxu0 %vm5046_vm2, %v4089_v25  ;;  %v5063_v25 = vld [vmem:[#allocation49_spill] sm:$0xff] }
 0x14a   : > { %2718 = vmatmul.msk.f32.gmra.mxu1 %vm5047_vm15, %v1773_v38  ;;  %vm5057_vm15 = vmmov %vm5055_vm10  ;;  %vm5064_vm12 = vnez %v5063_v25  ;;  %vm5065_vm10 = vcmp.lt.s32.totalorder %v4972_v15, 7 }
 0x14b   : > { %v1977_v55 = vsel %vm5057_vm15, %v4160_v14, 0.0  ;;  %v1884_v28 = vsel %vm5064_vm12, %v4211_v39, 0.0  ;;  %v1978_v54 = vsel %vm5065_vm10, %v4209_v33, 0.0  ;;  %vm5068_vm15 = vcmp.lt.s32.totalorder %v5004_v20, 7  ;;  %vm5072_vm12 = vmmov %vm5062_vm3  ;;  %v4373_v39 = vpop.f32.mrf.mxu0 }
 0x14c   : > { %2727 = vmatmul.msk.f32.gmra.mxu2 %vm5051_vm11, %v1882_v8  ;;  %vm5060_vm11 = vcmp.lt.s32.totalorder %v4984_v21, 7  ;;  %vm1870_vm10 = vcmp.lt.s32.totalorder %v5003_v19, 7 }
 0x14d   : > { %2737 = vmatmul.msk.f32.gmra.mxu3 %vm5052_vm14, %v1976_v12  ;;  %v1775_v1 = vsel %vm5060_vm11, %v4240_v61, 0.0  ;;  %vm5061_vm14 = vmmov %vm5046_vm2 }
 0x14e   : > { %vm5070_vm11 = vmmov %vm5062_vm3 }
 0x151   : > { %2709 = vmatmul.msk.f32.gmra.mxu0 %vm5056_vm7, %v4160_v14  ;;  %vm5067_vm7 = vmmov %vm5046_vm2  ;;  %v1768_v14 = vld [vmem:[#allocation2 + $0x49] sm:$0xff] }
 0x152   : > { %2719 = vmatmul.msk.f32.gmra.mxu1 %vm5046_vm2, %v1774_v48  ;;  %vm1869_vm2 = vcmp.lt.s32.totalorder %v4983_v22, 7  ;;  %v1776_v4 = vsel %vm5068_vm15, %v1768_v14, 0.0  ;;  %vm5075_vm15 = vmmov %vm5062_vm3 }
 0x154   : > { %2728 = vmatmul.msk.f32.gmra.mxu2 %vm5058_vm8, %v1883_v3  ;;  %vm5069_vm8 = vcmp.ge.s32.totalorder %v4984_v21, 1 }
 0x155   : > { %2738 = vmatmul.msk.f32.gmra.mxu3 %vm5059_vm4, %v1977_v55  ;;  %vm1877_vm4 = vmand %vm1869_vm2, %vm5069_vm8 }
 0x156   : > { %v1885_v15 = vsel %vm1877_vm4, %v4246_v5, 0.0  ;;  %v1980_v5 = vsel %vm1870_vm10, %v1972_v47, 0.0  ;;  %vm5076_vm8 = vmmov %vm5062_vm3 }
 0x157   : > { %vm5077_vm4 = vmmov %vm5062_vm3 }
 0x159   : > { %2710 = vmatmul.msk.f32.gmra.mxu0 %vm5061_vm14, %v4209_v33  ;;  %vm5071_vm14 = vmmov %vm5062_vm3  ;;  %v1979_v33 = vsel %vm1869_vm2, %v1682_v53, 0.0 }
 0x15a   : > { %2720 = vmatmul.msk.f32.gmra.mxu1 %vm5062_vm3, %v1775_v1 }
 0x15c   : > { %2729 = vmatmul.msk.f32.gmra.mxu2 %vm5066_vm6, %v1884_v28  ;;  %vm5073_vm6 = vcmp.ge.s32.totalorder %v5004_v20, 1 }
 0x15d   : > { %2739 = vmatmul.msk.f32.gmra.mxu3 %vm5067_vm7, %v1978_v54  ;;  %vm1878_vm7 = vmand %vm1870_vm10, %vm5073_vm6 }
 0x15e   : > { %v1886_v40 = vsel %vm1878_vm7, %v1862_v43, 0.0  ;;  %vm5089_vm7 = vmmov %vm5085_vm1 }
 0x161   : > { %2711 = vmatmul.msk.f32.gmra.mxu0 %vm5070_vm11, %v1682_v53  ;;  %vm5079_vm11 = vmmov %vm5062_vm3 }
 0x162   : > { %2721 = vmatmul.msk.f32.gmra.mxu1 %vm5071_vm14, %v1776_v4  ;;  %vm5081_vm14 = vmmov %vm5062_vm3 }
 0x164   : > { %2730 = vmatmul.msk.f32.gmra.mxu2 %vm5062_vm3, %v1885_v15  ;;  %vm5087_vm3 = vcmask 1045504  }
 0x165   : > { %2740 = vmatmul.msk.f32.gmra.mxu3 %vm5072_vm12, %v1979_v33  ;;  %2763 = vmatpush.msk.msrb.mxu2 %vm5087_vm3, %v2330_v45  ;;  %vm5088_vm12 = vcmp.lt.s32.totalorder %v4984_v21, 7 }
 0x166   : > { %vm2073_vm6 = vmand %vm1869_vm2, %vm5088_vm12  ;;  %vm5094_vm2 = vcmp.gt.f32.partialorder %v3326_v17, %v3849_v2  ;;  %vm5103_vm12 = vcmp.gt.f32.partialorder %v3418_v9, %v3773_v30 }
 0x169   : > { %2744 = vmatmul.msk.f32.vlgmr.msrb.gmra.mxu0 %vm5075_vm15, %v5074_v16  ;;  %vm5090_vm15 = vcmp.lt.s32.totalorder %v5004_v20, 7  ;;  %v2847_v16 = vld [vmem:[%s3111_s17 + $0xc0] sm:$0xff] }
 0x16b   : > { %v4389_v18 = vpop.f32.mrf.mxu0 }
 0x16c   : > { %2731 = vmatmul.msk.f32.gmra.mxu2 %vm5076_vm8, %v1886_v40  ;;  %v1450_v42 = vpop.f32.mrf.mxu1  ;;  %vm2074_vm8 = vmand %vm1870_vm10, %vm5090_vm15  ;;  %vm5095_vm10 = vcmask 48128  }
 0x16d   : > { %2741 = vmatmul.msk.f32.gmra.mxu3 %vm5077_vm4, %v1980_v5  ;;  %v2082_v21 = vsel %vm2074_vm8, %v2066_v23, 0.0  ;;  %vm5091_vm4 = vmmov %vm5085_vm1  ;;  %v1448_v5 = vadd.f32 %v1447_v41, %v4373_v39  ;;  %v2848_v39 = vld [vmem:[%s3111_s17 + $0xc8] sm:$0xff]  ;;  %vm5106_vm8 = vcmp.gt.f32.partialorder %v4965_v34, %v4051_v29 }
 0x16e   : > { %vm5102_vm3 = vmmov %vm5091_vm4 }
 0x16f   : > { %vm5105_vm15 = vmmov %vm5102_vm3 }
 0x171   : > { %2745 = vmatmul.msk.f32.gmra.mxu0 %vm5079_vm11, %v5078_v51  ;;  %v811_v51 = vsel %vm5094_vm2, %v2847_v16, %v3849_v2  ;;  %vm5096_vm11 = vcmp.gt.f32.partialorder %v3358_v56, %v3704_v59 }
 0x172   : > { %v1643_v49 = vpop.f32.mrf.mxu3  ;;  %v812_v17 = vsel %vm5096_vm11, %v2848_v39, %v3704_v59  ;;  %vm5109_vm11 = vcmp.gt.f32.partialorder %v4966_v52, %v4056_v60 }
 0x173   : > { %v4396_v10 = vpop.f32.mrf.mxu0  ;;  %v1549_v31 = vpop.f32.mrf.mxu2 }
 0x174   : > { %2764 = vmatmul.msk.f32.vlgmr.msrb.gmra.mxu2 %vm5095_vm10, %v811_v51 }
 0x179   : > { %2746 = vmatmul.msk.f32.gmra.mxu0 %vm5080_vm9, %v2077_v13  ;;  %vm5097_vm9 = vmmov %vm5095_vm10 }
 0x17a   : > { %v1646_v36 = vpop.f32.mrf.mxu3  ;;  %vm5108_vm10 = vmmov %vm5102_vm3 }
 0x17b   : > { %v1552_v44 = vpop.f32.mrf.mxu2 }
 0x17c   : > { %v4403_v6 = vpop.f32.mrf.mxu0  ;;  %2765 = vmatmul.msk.f32.gmra.mxu2 %vm5097_vm9, %v812_v17 }
 0x181   : > { %2747 = vmatmul.msk.f32.gmra.mxu0 %vm5081_vm14, %v2078_v46  ;;  %v1453_v46 = vpop.f32.mrf.mxu1  ;;  %vm5098_vm14 = vcmp.gt.f32.partialorder %v4935_v11, %v3942_v58  ;;  %v4520_v11 = vld [vmem:[%s4724_s11] ss:$0 sm:$0xff] }
 0x182   : > { %v1454_v51 = vadd.f32 %v1453_v46, %v4396_v10 }
 0x183   : > { %v4432_v35 = vpop.f32.mrf.mxu2 }
 0x185   : > { %v4441_v61 = vpop.f32.mrf.mxu3 }
 0x186   : > { %v4410_v27 = vpop.f32.mrf.mxu0 }
 0x189   : > { %2748 = vmatmul.msk.f32.gmra.mxu0 %vm5083_vm13, %v5082_v63  ;;  %v4447_v7 = vpop.f32.mrf.mxu1  ;;  %v1573_v63 = vadd.f32 %v1549_v31, %v1448_v5  ;;  %vm5099_vm13 = vmmov %vm5097_vm9 }
 0x18e   : > { %v4417_v13 = vpop.f32.mrf.mxu0 }
 0x18f   : > { %v4449_v0 = vpop.f32.mrf.mxu2 }
 0x190   : > { %v4454_v22 = vpop.f32.mrf.mxu3 }
 0x191   : > { %2749 = vmatmul.msk.f32.gmra.mxu0 %vm5085_vm1, %v2080_v57  ;;  %v2081_v57 = vsel %vm2073_vm6, %v1768_v14, 0.0  ;;  %v4456_v8 = vpop.f32.mrf.mxu1  ;;  %vm5101_vm1 = vmmov %vm5097_vm9 }
 0x192   : > { %vm5104_vm6 = vmmov %vm5101_vm1 }
 0x193   : > { %vm5110_vm9 = vmmov %vm5101_vm1 }
 0x196   : > { %v4434_v62 = vpop.f32.mrf.mxu0 }
 0x197   : > { %v4458_v12 = vpop.f32.mrf.mxu2 }
 0x198   : > { %v4460_v20 = vpop.f32.mrf.mxu3 }
 0x199   : > { %2750 = vmatmul.msk.f32.gmra.mxu0 %vm5089_vm7, %v2081_v57  ;;  %v4462_v48 = vpop.f32.mrf.mxu1  ;;  %v1667_v57 = vadd.f32 %v1643_v49, %v1573_v63  ;;  %v1457_v63 = vadd.f32 %v4447_v7, %v4403_v6 }
 0x19e   : > { %v4451_v38 = vpop.f32.mrf.mxu0 }
 0x19f   : > { %v4464_v3 = vpop.f32.mrf.mxu2 }
 0x1a0   : > { %v4466_v1 = vpop.f32.mrf.mxu3 }
 0x1a1   : > { %2751 = vmatmul.msk.f32.gmra.mxu0 %vm5091_vm4, %v2082_v21  ;;  %v4468_v25 = vpop.f32.mrf.mxu1  ;;  %vm5107_vm4 = vmmov %vm5101_vm1 }
 0x1a6   : > { %v1729_v26 = vpop.f32.mrf.mxu0 }
 0x1a7   : > { %v4470_v28 = vpop.f32.mrf.mxu2 }
 0x1a8   : > { %v4474_v14 = vpop.f32.mrf.mxu3 }
 0x1a9   : > { %v4476_v53 = vpop.f32.mrf.mxu1 }
 0x1ae   : > { %v1732_v19 = vpop.f32.mrf.mxu0 }
 0x1af   : > { %v4478_v4 = vpop.f32.mrf.mxu2 }
 0x1b0   : > { %5092 = vst [vmem:[#allocation30_spill] sm:$0xff] %v4478_v4  ;;  %v4482_v33 = vpop.f32.mrf.mxu3  ;;  %v1753_v4 = vadd.f32 %v1729_v26, %v1667_v57  ;;  %v2849_v26 = vld [vmem:[%s3111_s17 + $0xd0] sm:$0xff] }
 0x1b1   : > { %5093 = vst [vmem:[#allocation24_spill] sm:$0xff] %v4482_v33  ;;  %v1823_v47 = vpop.f32.mrf.mxu1  ;;  %v1451_v33 = vadd.f32 %v1450_v42, %v4389_v18  ;;  %v813_v56 = vsel %vm5098_vm14, %v2849_v26, %v3942_v58 }
 0x1b2   : > { %v1847_v31 = vadd.f32 %v1823_v47, %v1753_v4  ;;  %2766 = vmatmul.msk.f32.gmra.mxu2 %vm5099_vm13, %v813_v56  ;;  %vm5111_vm13 = vmmov %vm5102_vm3 }
 0x1b3   : > { %v1574_v2 = vadd.f32 %v1552_v44, %v1451_v33  ;;  %v1575_v44 = vadd.f32 %v4432_v35, %v1454_v51 }
 0x1b5   : > { %v1668_v49 = vadd.f32 %v1646_v36, %v1574_v2  ;;  %v4515_v36 = vld [vmem:[%s4723_s10] ss:$0 sm:$0xff]  ;;  %v1669_v58 = vadd.f32 %v4441_v61, %v1575_v44  ;;  %v1576_v61 = vadd.f32 %v4449_v0, %v1457_v63  ;;  %v1460_v0 = vadd.f32 %v4456_v8, %v4410_v27 }
 0x1b6   : > { %v1735_v55 = vpop.f32.mrf.mxu0 }
 0x1b7   : > { %v1933_v40 = vpop.f32.mrf.mxu2  ;;  %v1754_v18 = vadd.f32 %v1732_v19, %v1668_v49  ;;  %v1670_v24 = vadd.f32 %v4454_v22, %v1576_v61  ;;  %v1577_v22 = vadd.f32 %v4458_v12, %v1460_v0  ;;  %v1463_v12 = vadd.f32 %v4462_v48, %v4417_v13 }
 0x1b8   : > { %v2027_v50 = vpop.f32.mrf.mxu3  ;;  %v1957_v16 = vadd.f32 %v1933_v40, %v1847_v31  ;;  %v4524_v40 = vstv %s2752_s27  ;;  %v1469_v0 = vadd.f32 %v4476_v53, %v4451_v38  ;;  %v5115_v38 = vld [vmem:[#allocation24_spill] sm:$0xff]  ;;  %s500_s27 = sand.u32 1, %s2928_s19  }
 0x1b9   : > { %v1826_v23 = vpop.f32.mrf.mxu1  ;;  %v1671_v9 = vadd.f32 %v4460_v20, %v1577_v22  ;;  %v1578_v20 = vadd.f32 %v4464_v3, %v1463_v12  ;;  %v1466_v3 = vadd.f32 %v4468_v25, %v4434_v62  ;;  %s2571_s26 = sshll.u32 %s500_s27, 6  ;;  %s2443_s16 = scalar_lea.sflag [#allocation4], %s500_s27 }
 0x1ba   : > { %v2051_v4 = vadd.f32 %v2027_v50, %v1957_v16  ;;  %v1848_v46 = vadd.f32 %v1826_v23, %v1754_v18  ;;  %v1755_v50 = vadd.f32 %v1735_v55, %v1669_v58  ;;  %v2850_v23 = vld [vmem:[%s3111_s17 + $0xd8] sm:$0xff]  ;;  %v2851_v18 = vld [vmem:[%s3111_s17 + $0xe0] sm:$0xff]  ;;  %s4635_s30 = scalar_lea.vmem [#allocation6], %s2571_s26 }
 0x1bb   : > { %v814_v39 = vsel %vm5100_vm5, %v2850_v23, %v3949_v32  ;;  %v1672_v23 = vadd.f32 %v4466_v1, %v1578_v20  ;;  %v1579_v1 = vadd.f32 %v4470_v28, %v1466_v3  ;;  %v4615_v3 = vld [vmem:[%s4725_s12] ss:$0 sm:$0xff]  ;;  %s2460_s29 = sshll.u32 %s4635_s30, 4  ;;  %s2461_s29 = int_to_ptr.vmem [resolvable:$true] %s2460_s29 }
 0x1bc   : > { %2767 = vmatmul.msk.f32.gmra.mxu2 %vm5101_vm1, %v814_v39 }
 0x1be   : > { %v4472_v54 = vpop.f32.mrf.mxu0 }
 0x1bf   : > { %v1936_v21 = vpop.f32.mrf.mxu2 }
 0x1c0   : > { %v2030_v5 = vpop.f32.mrf.mxu3  ;;  %v1958_v33 = vadd.f32 %v1936_v21, %v1848_v46 }
 0x1c1   : > { %v1829_v42 = vpop.f32.mrf.mxu1 }
 0x1c2   : > { %v2052_v21 = vadd.f32 %v2030_v5, %v1958_v33  ;;  %v1849_v55 = vadd.f32 %v1829_v42, %v1755_v50  ;;  %v1756_v5 = vadd.f32 %v4472_v54, %v1670_v24  ;;  %v815_v42 = vsel %vm5103_vm12, %v2851_v18, %v3773_v30  ;;  %v2852_v33 = vld [vmem:[%s3111_s17 + $0xe8] sm:$0xff] }
 0x1c3   : > { %v1673_v24 = vadd.f32 %v4474_v14, %v1579_v1  ;;  %v5114_v14 = vld [vmem:[#allocation30_spill] sm:$0xff] }
 0x1c4   : > { %2768 = vmatmul.msk.f32.gmra.mxu2 %vm5104_vm6, %v815_v42  ;;  %vm5116_vm6 = vmmov %vm5102_vm3 }
 0x1c6   : > { %v4480_v15 = vpop.f32.mrf.mxu0 }
 0x1c7   : > { %v1939_v59 = vpop.f32.mrf.mxu2 }
 0x1c8   : > { %v2033_v35 = vpop.f32.mrf.mxu3  ;;  %v1959_v32 = vadd.f32 %v1939_v59, %v1849_v55 }
 0x1c9   : > { %v1832_v17 = vpop.f32.mrf.mxu1 }
 0x1ca   : > { %v2053_v56 = vadd.f32 %v2033_v35, %v1959_v32  ;;  %v1850_v54 = vadd.f32 %v1832_v17, %v1756_v5  ;;  %v2854_v32 = vld [vmem:[%s3111_s17 + $0xf8] sm:$0xff] }
 0x1ce   : > { %v4484_v43 = vpop.f32.mrf.mxu0 }
 0x1cf   : > { %v1942_v6 = vpop.f32.mrf.mxu2 }
 0x1d0   : > { %v2036_v26 = vpop.f32.mrf.mxu3  ;;  %v1960_v30 = vadd.f32 %v1942_v6, %v1850_v54 }
 0x1d1   : > { %v1835_v59 = vpop.f32.mrf.mxu1 }
 0x1d2   : > { %v2054_v35 = vadd.f32 %v2036_v26, %v1960_v30  ;;  %v1580_v26 = vadd.f32 %v5114_v14, %v1469_v0 }
 0x1d4   : > { %v1674_v53 = vadd.f32 %v5115_v38, %v1580_v26 }
 0x1d6   : > { %v4493_v45 = vpop.f32.mrf.mxu0 }
 0x1d7   : > { %v1759_v5 = vadd.f32 %v4493_v45, %v1673_v24 }
 0x1d8   : > { %v2039_v13 = vpop.f32.mrf.mxu3 }
 0x1d9   : > { %v1838_v34 = vpop.f32.mrf.mxu1 }
 0x1de   : > { %v4502_v41 = vpop.f32.mrf.mxu0 }
 0x1e6   : > { %v2129_v10 = vpop.f32.mrf.mxu0 }
 0x1e7   : > { %v2153_v19 = vadd.f32 %v2129_v10, %v2051_v4  ;;  %v1945_v10 = vpop.f32.mrf.mxu2 }
 0x1e9   : > { %v2165_v47 = vmul.f32 %v4515_v36, %v2153_v19  ;;  %v1757_v19 = vadd.f32 %v4480_v15, %v1671_v9 }
 0x1eb   : > { %v2177_v57 = vadd.f32 %v4520_v11, %v2165_v47  ;;  %v816_v47 = vsel %vm5106_vm8, %v2852_v33, %v4051_v29  ;;  %v1851_v15 = vadd.f32 %v1835_v59, %v1757_v19 }
 0x1ec   : > { %2769 = vmatmul.msk.f32.gmra.mxu2 %vm5107_vm4, %v816_v47  ;;  %vm5118_vm4 = vmmov %vm5102_vm3 }
 0x1ed   : > { %v2195_v2 = vmul.f32 %v4524_v40, %v2177_v57  ;;  %vm2185_vm0 = vcmp.gt.f32.partialorder %v2177_v57, 0.0  ;;  %v1961_v29 = vadd.f32 %v1945_v10, %v1851_v15 }
 0x1ee   : > { %v2132_v7 = vpop.f32.mrf.mxu0 }
 0x1ef   : > { %v2154_v31 = vadd.f32 %v2132_v7, %v2052_v21  ;;  %v2203_v49 = vsel %vm2185_vm0, %v2177_v57, %v2195_v2  ;;  %v1948_v61 = vpop.f32.mrf.mxu2  ;;  %v1758_v21 = vadd.f32 %v4484_v43, %v1672_v23  ;;  %v2853_v2 = vld [vmem:[%s3111_s17 + $0xf0] sm:$0xff]  ;;  %v2055_v7 = vadd.f32 %v2039_v13, %v1961_v29  ;;  %s2762_s17 = sld [smem:[#allocation3 + $0x2]] }
 0x1f0   : > { %2754 = vmatmul.msk.f32.vlgmr.msrb.gmra.mxu1 %vm5102_vm3, %v2203_v49  ;;  %v817_v6 = vsel %vm5109_vm11, %v2853_v2, %v4056_v60  ;;  %v2042_v49 = vpop.f32.mrf.mxu3  ;;  %vm2433_vm11 = vcmask 130048  }
 0x1f1   : > { %v2166_v16 = vmul.f32 %v4515_v36, %v2154_v31  ;;  %v1852_v25 = vadd.f32 %v1838_v34, %v1758_v21 }
 0x1f3   : > { %v2178_v51 = vadd.f32 %v4520_v11, %v2166_v16  ;;  %v1962_v52 = vadd.f32 %v1948_v61, %v1852_v25  ;;  %v5112_v16 = vld [vmem:[#allocation22_spill] sm:$0xff] }
 0x1f4   : > { %2770 = vmatmul.msk.f32.gmra.mxu2 %vm5110_vm9, %v817_v6  ;;  %vm5113_vm5 = vcmp.gt.f32.partialorder %v5112_v16, %v3862_v37 }
 0x1f5   : > { %vm2186_vm7 = vcmp.gt.f32.partialorder %v2178_v51, 0.0  ;;  %v2196_v27 = vmul.f32 %v4524_v40, %v2178_v51  ;;  %v818_v28 = vsel %vm5113_vm5, %v2854_v32, %v3862_v37  ;;  %v2056_v22 = vadd.f32 %v2042_v49, %v1962_v52 }
 0x1f6   : > { %v2135_v8 = vpop.f32.mrf.mxu0 }
 0x1f7   : > { %v2155_v44 = vadd.f32 %v2135_v8, %v2053_v56  ;;  %v2204_v4 = vsel %vm2186_vm7, %v2178_v51, %v2196_v27  ;;  %v1841_v51 = vpop.f32.mrf.mxu1  ;;  %v1951_v42 = vpop.f32.mrf.mxu2 }
 0x1f8   : > { %2755 = vmatmul.msk.f32.gmra.mxu1 %vm5105_vm15, %v2204_v4  ;;  %v1853_v8 = vadd.f32 %v1841_v51, %v1759_v5  ;;  %v1760_v4 = vadd.f32 %v4502_v41, %v1674_v53  ;;  %vm5117_vm15 = vmmov %vm5102_vm3 }
 0x1f9   : > { %v2167_v46 = vmul.f32 %v4515_v36, %v2155_v44  ;;  %v2045_v44 = vpop.f32.mrf.mxu3 }
 0x1fa   : > { %v1963_v45 = vadd.f32 %v1951_v42, %v1853_v8 }
 0x1fb   : > { %v2179_v58 = vadd.f32 %v4520_v11, %v2167_v46 }
 0x1fc   : > { %2771 = vmatmul.msk.f32.gmra.mxu2 %vm5101_vm1, %v818_v28  ;;  %v2057_v30 = vadd.f32 %v2045_v44, %v1963_v45 }
 0x1fd   : > { %vm2187_vm2 = vcmp.gt.f32.partialorder %v2179_v58, 0.0  ;;  %v2197_v63 = vmul.f32 %v4524_v40, %v2179_v58 }
 0x1fe   : > { %v2138_v48 = vpop.f32.mrf.mxu0 }
 0x1ff   : > { %v2156_v50 = vadd.f32 %v2138_v48, %v2054_v35  ;;  %v2205_v57 = vsel %vm2187_vm2, %v2179_v58, %v2197_v63  ;;  %v1844_v9 = vpop.f32.mrf.mxu1  ;;  %v1954_v12 = vpop.f32.mrf.mxu2 }
 0x200   : > { %2756 = vmatmul.msk.f32.gmra.mxu1 %vm5108_vm10, %v2205_v57  ;;  %v1854_v58 = vadd.f32 %v1844_v9, %v1760_v4 }
 0x201   : > { %v2168_v39 = vmul.f32 %v4515_v36, %v2156_v50  ;;  %v2048_v41 = vpop.f32.mrf.mxu3 }
 0x202   : > { %v1964_v20 = vadd.f32 %v1954_v12, %v1854_v58 }
 0x203   : > { %v2180_v17 = vadd.f32 %v4520_v11, %v2168_v39 }
 0x204   : > { %v2058_v13 = vadd.f32 %v2048_v41, %v1964_v20 }
 0x205   : > { %vm2188_vm14 = vcmp.gt.f32.partialorder %v2180_v17, 0.0  ;;  %v2198_v55 = vmul.f32 %v4524_v40, %v2180_v17 }
 0x206   : > { %v2141_v62 = vpop.f32.mrf.mxu0 }
 0x207   : > { %v2157_v43 = vadd.f32 %v2141_v62, %v2055_v7  ;;  %v2206_v31 = vsel %vm2188_vm14, %v2180_v17, %v2198_v55  ;;  %v2375_v61 = vpop.f32.mrf.mxu2  ;;  %v4623_v17 = vstv %s2762_s17  ;;  %v4630_v7 = vstv %s2772_s20  ;;  %s2886_s20 = scalar_lea.hbm %s2885_s23, 64 }
 0x208   : > { %2757 = vmatmul.msk.f32.gmra.mxu1 %vm5111_vm13, %v2206_v31  ;;  %p2887_p0 = scmp.ne.s32.totalorder %s2885_s23, %s2886_s20  ;;  %p2892_p4 = scmp.lt.s32.totalorder %s2890_s24, %s2886_s20 }
 0x209   : > { %v2169_v60 = vmul.f32 %v4515_v36, %v2157_v43 }
 0x20a   : > { %p2888_p1 = pnand %p2887_p0, %p3061_p5  ;;  %p2893_p7 = por %p2892_p4, %p2891_p3 }
 0x20b   : > { %v2181_v18 = vadd.f32 %v4520_v11, %v2169_v60 }
 0x20c   : > { %p2889_p2 = pneg %p2888_p1 }
 0x20d   : > { %vm2189_vm0 = vcmp.gt.f32.partialorder %v2181_v18, 0.0  ;;  %v2199_v56 = vmul.f32 %v4524_v40, %v2181_v18 }
 0x20e   : > { %v2144_v27 = vpop.f32.mrf.mxu0  ;;  %p2894_p8 = pnand %p2893_p7, %p2889_p2 }
 0x20f   : > { %v2158_v37 = vadd.f32 %v2144_v27, %v2056_v22  ;;  %v2207_v54 = vsel %vm2189_vm0, %v2181_v18, %v2199_v56  ;;  %v2378_v21 = vpop.f32.mrf.mxu2 }
 0x210   : > { %2758 = vmatmul.msk.f32.gmra.mxu1 %vm5102_vm3, %v2207_v54 }
 0x211   : > { %v2170_v59 = vmul.f32 %v4515_v36, %v2158_v37 }
 0x213   : > { %v2182_v10 = vadd.f32 %v4520_v11, %v2170_v59 }
 0x215   : > { %vm2190_vm12 = vcmp.gt.f32.partialorder %v2182_v10, 0.0  ;;  %v2200_v46 = vmul.f32 %v4524_v40, %v2182_v10 }
 0x216   : > { %v2147_v19 = vpop.f32.mrf.mxu0 }
 0x217   : > { %v2159_v33 = vadd.f32 %v2147_v19, %v2057_v30  ;;  %v2208_v47 = vsel %vm2190_vm12, %v2182_v10, %v2200_v46 }
 0x218   : > { %2759 = vmatmul.msk.f32.gmra.mxu1 %vm5116_vm6, %v2208_v47 }
 0x219   : > { %v2171_v35 = vmul.f32 %v4515_v36, %v2159_v33 }
 0x21b   : > { %v2183_v63 = vadd.f32 %v4520_v11, %v2171_v35 }
 0x21d   : > { %vm2191_vm7 = vcmp.gt.f32.partialorder %v2183_v63, 0.0  ;;  %v2201_v48 = vmul.f32 %v4524_v40, %v2183_v63 }
 0x21e   : > { %v2150_v15 = vpop.f32.mrf.mxu0 }
 0x21f   : > { %v2160_v50 = vadd.f32 %v2150_v15, %v2058_v13  ;;  %v2209_v57 = vsel %vm2191_vm7, %v2183_v63, %v2201_v48 }
 0x220   : > { %2760 = vmatmul.msk.f32.gmra.mxu1 %vm5117_vm15, %v2209_v57 }
 0x221   : > { %v2172_v23 = vmul.f32 %v4515_v36, %v2160_v50  ;;  %v4620_v36 = vld [vmem:[%s4726_s13] ss:$0 sm:$0xff] }
 0x223   : > { %v2184_v34 = vadd.f32 %v4520_v11, %v2172_v23 }
 0x225   : > { %vm2192_vm8 = vcmp.gt.f32.partialorder %v2184_v34, 0.0  ;;  %v2202_v29 = vmul.f32 %v4524_v40, %v2184_v34 }
 0x227   : > { %v2210_v39 = vsel %vm2192_vm8, %v2184_v34, %v2202_v29 }
 0x228   : > { %2761 = vmatmul.msk.f32.gmra.mxu1 %vm5118_vm4, %v2210_v39 }
 0x235   : > { %v2381_v49 = vpop.f32.mrf.mxu2 }
 0x23f   : > { %v2384_v42 = vpop.f32.mrf.mxu2 }
 0x247   : > { %v2387_v53 = vpop.f32.mrf.mxu2 }
 0x26d   : > { %v2256_v11 = vpop.f32.mrf.mxu1 }
 0x26e   : > { %v2284_v40 = vmul.f32 %v4615_v3, %v2256_v11 }
 0x26f   : > { %v2390_v33 = vpop.f32.mrf.mxu2 }
 0x270   : > { %v2296_v2 = vadd.f32 %v4620_v36, %v2284_v40 }
 0x272   : > { %vm2304_vm2 = vcmp.gt.f32.partialorder %v2296_v2, 0.0  ;;  %v2314_v6 = vmul.f32 %v4623_v17, %v2296_v2 }
 0x274   : > { %v2322_v1 = vsel %vm2304_vm2, %v2296_v2, %v2314_v6 }
 0x275   : > { %v2399_v55 = vadd.f32 %v2375_v61, %v2322_v1  ;;  %v2259_v62 = vpop.f32.mrf.mxu1 }
 0x276   : > { %v2285_v25 = vmul.f32 %v4615_v3, %v2259_v62 }
 0x277   : > { %vm2407_vm10 = vcmp.gt.f32.partialorder %v2399_v55, 0.0  ;;  %v2417_v43 = vmul.f32 %v4630_v7, %v2399_v55  ;;  %v2393_v23 = vpop.f32.mrf.mxu2 }
 0x278   : > { %v2297_v31 = vadd.f32 %v4620_v36, %v2285_v25 }
 0x279   : > { %v2425_v24 = vsel %vm2407_vm10, %v2399_v55, %v2417_v43 }
 0x27a   : > { %2434 = vst.msk [vmem:[%s4635_s30] sm:$0xff] %vm2433_vm11, %v2425_v24  ;;  %vm2305_vm9 = vcmp.gt.f32.partialorder %v2297_v31, 0.0  ;;  %v2315_v52 = vmul.f32 %v4623_v17, %v2297_v31 }
 0x27c   : > { %v2323_v60 = vsel %vm2305_vm9, %v2297_v31, %v2315_v52 }
 0x27d   : > { %v2400_v32 = vadd.f32 %v2378_v21, %v2323_v60  ;;  %v2262_v16 = vpop.f32.mrf.mxu1 }
 0x27e   : > { %v2286_v28 = vmul.f32 %v4615_v3, %v2262_v16 }
 0x27f   : > { %vm2408_vm14 = vcmp.gt.f32.partialorder %v2400_v32, 0.0  ;;  %v2418_v0 = vmul.f32 %v4630_v7, %v2400_v32  ;;  %v2396_v55 = vpop.f32.mrf.mxu2 }
 0x280   : > { %v2298_v5 = vadd.f32 %v4620_v36, %v2286_v28 }
 0x281   : > { %v2426_v51 = vsel %vm2408_vm14, %v2400_v32, %v2418_v0 }
 0x282   : > { %2435 = vst.msk [vmem:[%s4635_s30 + $0x8] sm:$0xff] %vm2433_vm11, %v2426_v51  ;;  %vm2306_vm13 = vcmp.gt.f32.partialorder %v2298_v5, 0.0  ;;  %v2316_v18 = vmul.f32 %v4623_v17, %v2298_v5 }
 0x284   : > { %v2324_v14 = vsel %vm2306_vm13, %v2298_v5, %v2316_v18 }
 0x285   : > { %v2401_v26 = vadd.f32 %v2381_v49, %v2324_v14  ;;  %v2265_v22 = vpop.f32.mrf.mxu1 }
 0x286   : > { %v2287_v56 = vmul.f32 %v4615_v3, %v2265_v22 }
 0x287   : > { %vm2409_vm5 = vcmp.gt.f32.partialorder %v2401_v26, 0.0  ;;  %v2419_v27 = vmul.f32 %v4630_v7, %v2401_v26 }
 0x288   : > { %v2299_v8 = vadd.f32 %v4620_v36, %v2287_v56 }
 0x289   : > { %v2427_v37 = vsel %vm2409_vm5, %v2401_v26, %v2419_v27 }
 0x28a   : > { %2436 = vst.msk [vmem:[%s4635_s30 + $0x10] sm:$0xff] %vm2433_vm11, %v2427_v37  ;;  %vm2307_vm1 = vcmp.gt.f32.partialorder %v2299_v8, 0.0  ;;  %v2317_v54 = vmul.f32 %v4623_v17, %v2299_v8 }
 0x28c   : > { %v2325_v38 = vsel %vm2307_vm1, %v2299_v8, %v2317_v54 }
 0x28d   : > { %v2402_v45 = vadd.f32 %v2384_v42, %v2325_v38  ;;  %v2268_v59 = vpop.f32.mrf.mxu1 }
 0x28e   : > { %v2288_v44 = vmul.f32 %v4615_v3, %v2268_v59 }
 0x28f   : > { %vm2410_vm0 = vcmp.gt.f32.partialorder %v2402_v45, 0.0  ;;  %v2420_v4 = vmul.f32 %v4630_v7, %v2402_v45 }
 0x290   : > { %v2300_v10 = vadd.f32 %v4620_v36, %v2288_v44 }
 0x291   : > { %v2428_v9 = vsel %vm2410_vm0, %v2402_v45, %v2420_v4 }
 0x292   : > { %2437 = vst.msk [vmem:[%s4635_s30 + $0x18] sm:$0xff] %vm2433_vm11, %v2428_v9  ;;  %vm2308_vm3 = vcmp.gt.f32.partialorder %v2300_v10, 0.0  ;;  %v2318_v30 = vmul.f32 %v4623_v17, %v2300_v10 }
 0x294   : > { %v2326_v46 = vsel %vm2308_vm3, %v2300_v10, %v2318_v30 }
 0x295   : > { %v2403_v12 = vadd.f32 %v2387_v53, %v2326_v46  ;;  %v2271_v19 = vpop.f32.mrf.mxu1 }
 0x296   : > { %v2289_v58 = vmul.f32 %v4615_v3, %v2271_v19 }
 0x297   : > { %vm2411_vm12 = vcmp.gt.f32.partialorder %v2403_v12, 0.0  ;;  %v2421_v47 = vmul.f32 %v4630_v7, %v2403_v12 }
 0x298   : > { %v2301_v20 = vadd.f32 %v4620_v36, %v2289_v58 }
 0x299   : > { %v2429_v35 = vsel %vm2411_vm12, %v2403_v12, %v2421_v47 }
 0x29a   : > { %2438 = vst.msk [vmem:[%s4635_s30 + $0x20] sm:$0xff] %vm2433_vm11, %v2429_v35  ;;  %vm2309_vm6 = vcmp.gt.f32.partialorder %v2301_v20, 0.0  ;;  %v2319_v63 = vmul.f32 %v4623_v17, %v2301_v20 }
 0x29c   : > { %v2327_v41 = vsel %vm2309_vm6, %v2301_v20, %v2319_v63 }
 0x29d   : > { %v2404_v13 = vadd.f32 %v2390_v33, %v2327_v41  ;;  %v2274_v48 = vpop.f32.mrf.mxu1 }
 0x29e   : > { %v2290_v15 = vmul.f32 %v4615_v3, %v2274_v48 }
 0x29f   : > { %vm2412_vm7 = vcmp.gt.f32.partialorder %v2404_v13, 0.0  ;;  %v2422_v50 = vmul.f32 %v4630_v7, %v2404_v13 }
 0x2a0   : > { %v2302_v57 = vadd.f32 %v4620_v36, %v2290_v15 }
 0x2a1   : > { %v2430_v34 = vsel %vm2412_vm7, %v2404_v13, %v2422_v50 }
 0x2a2   : > { %2439 = vst.msk [vmem:[%s4635_s30 + $0x28] sm:$0xff] %vm2433_vm11, %v2430_v34  ;;  %vm2310_vm15 = vcmp.gt.f32.partialorder %v2302_v57, 0.0  ;;  %v2320_v29 = vmul.f32 %v4623_v17, %v2302_v57 }
 0x2a4   : > { %v2328_v39 = vsel %vm2310_vm15, %v2302_v57, %v2320_v29 }
 0x2a5   : > { %v2405_v61 = vadd.f32 %v2393_v23, %v2328_v39  ;;  %v2277_v11 = vpop.f32.mrf.mxu1 }
 0x2a6   : > { %v2291_v40 = vmul.f32 %v4615_v3, %v2277_v11 }
 0x2a7   : > { %vm2413_vm8 = vcmp.gt.f32.partialorder %v2405_v61, 0.0  ;;  %v2423_v21 = vmul.f32 %v4630_v7, %v2405_v61 }
 0x2a8   : > { %v2303_v2 = vadd.f32 %v4620_v36, %v2291_v40 }
 0x2a9   : > { %v2431_v6 = vsel %vm2413_vm8, %v2405_v61, %v2423_v21 }
 0x2aa   : > { %2440 = vst.msk [vmem:[%s4635_s30 + $0x30] sm:$0xff] %vm2433_vm11, %v2431_v6  ;;  %vm2311_vm4 = vcmp.gt.f32.partialorder %v2303_v2, 0.0  ;;  %v2321_v1 = vmul.f32 %v4623_v17, %v2303_v2 }
 0x2ac   : > { %v2329_v3 = vsel %vm2311_vm4, %v2303_v2, %v2321_v1 }
 0x2ad   : > { %v2406_v62 = vadd.f32 %v2396_v55, %v2329_v3 }
 0x2af   : > { %vm2414_vm2 = vcmp.gt.f32.partialorder %v2406_v62, 0.0  ;;  %v2424_v36 = vmul.f32 %v4630_v7, %v2406_v62 }
 0x2b1   : > { %v2432_v25 = vsel %vm2414_vm2, %v2406_v62, %v2424_v36 }
 0x2b2   : > { %2441 = vst.msk [vmem:[%s4635_s30 + $0x38] sm:$0xff] %vm2433_vm11, %v2432_v25 }
 0x2b3   : > { %2897 = shalt.err (!%p2894_p8)
}
 0x2b4   : > { %s2941_s27 = smov 128   ;;  %s2942_s30 = smov 8  }
 0x2b5   : > { %2788 = dma.vmem_to_hbm [thread:$0]  (%p3061_p5), %s2461_s29, 1024, %s2463_s22, %s2443_s16, %s2941_s27, %s2941_s27, %s2942_s30  }
 0x2b6 PF: > { %p2800_p9 = scmp.ge.s32.totalorder %s2936_s21, 2  ;;  %s2480_s26 = sand.u32 1, %s2924_s18  }
 0x2b7   : > { %s2481_s0 = scalar_lea.sflag [#allocation4], %s2480_s26 }
 0x2b8   : > { %p2795_p10 = pnand %p2800_p9, %p3065_p6 }
 0x2ba   : > { %p2796_p11 = pneg %p2795_p10 }
 0x2bc   : > { %2919 = dma.done.wait (%p2796_p11), %s2481_s0, 1024  }
 0x2bd   : > { %2921 = vsyncadd (%p2796_p11), %s2481_s0, 4294966272  ;;  %s5120_s21 = sld [smem:[#allocation10_spill]]  ;;  %s5123_s18 = smov %s2928_s19 }
 0x2be   : > { %s5121_s23 = sld [smem:[#allocation9_spill]] }
 0x2bf   : > { %s5122_s20 = sld [smem:[#allocation11_spill]] }
 0x2c3   : > { %p27_p12 = scmp.ge.s32.totalorder %s5120_s21, 4  }
 0x2c4   : > { %s5124_s19 = smov %s5121_s23 }
 0x2c5   :  { %29 = sbr.rel (!%p27_p12) target bundleno = 7 (0x7), region = 142 }
 0x2ca   :  { %2495 = vsyncpa [#allocation4], 1 }
 0x2cb   :  { %2497 = vsyncpa [#allocation4 + $0x1], 1 }
 0x2cc   :  { %2498 = vsyncpa [#allocation5], 1 }
 0x2cd   :  { %2500 = vsyncpa [#allocation5 + $0x1], 1 }

</bundles_post_ra>
